<compile_context>
chip_gen: v6e
topology: v6e:2x2x1
jax: 0.10.0
libtpu: 0.0.40
codegen_flags: <defaults>
</compile_context>

<pallas_src>
import numpy as np
import jax
import jax.numpy as jnp
from jax.experimental import pallas as pl
from jax.experimental.pallas import tpu as pltpu


# ----------------------------------------------------------------------------
# Pallas kernel: TS LSTM timesteps per grid iteration, state carried in VMEM
# ----------------------------------------------------------------------------
def _lstm_block_kernel(x_ref, mask_ref, h0_ref, c0_ref, wih_ref, whh_ref, b_ref,
                       out_ref, hn_ref, cn_ref, h_sc, c_sc, gx_sc):
    tblk = pl.program_id(1)
    n_tblk = pl.num_programs(1)
    TS, TB, I = x_ref.shape
    Hp = h_sc.shape[-1]
    NG = gx_sc.shape[-1]                               # 4 * Hp

    # Initialize the carried state at the first time block (per batch tile).
    @pl.when(tblk == 0)
    def _():
        h_sc[...] = h0_ref[...]
        c_sc[...] = c0_ref[...]

    # Hoisted input projection for the whole time block: one big MXU matmul
    # (TS*TB, I) x (I, 4*Hp) in bf16 with f32 accumulation, plus bias.
    x2 = x_ref[...].reshape(TS * TB, I).astype(jnp.bfloat16)
    gx = jnp.dot(x2, wih_ref[...], preferred_element_type=jnp.float32)
    gx_sc[...] = (gx + b_ref[...]).reshape(TS, TB, NG)

    whh = whh_ref[...]                                 # bf16 (Hp, 4*Hp), resident

    def step(k, carry):
        h, c = carry                                   # f32 (TB, Hp) each
        # Recurrent half of the gates only: h @ W_hh (bf16 operands, f32 acc).
        gates = gx_sc[k] + jnp.dot(h.astype(jnp.bfloat16), whh,
                                   preferred_element_type=jnp.float32)
        # PyTorch LSTM gate order [i, f, g, o]; each gate is a lane-aligned
        # Hp-wide (multiple of 128) slab — no intra-vreg lane slicing.
        i_g = jax.nn.sigmoid(gates[:, 0 * Hp:1 * Hp])
        f_g = jax.nn.sigmoid(gates[:, 1 * Hp:2 * Hp])
        g_g = jnp.tanh(gates[:, 2 * Hp:3 * Hp])
        o_g = jax.nn.sigmoid(gates[:, 3 * Hp:4 * Hp])

        c_new = f_g * c + i_g * g_g
        h_new = o_g * jnp.tanh(c_new)

        m = mask_ref[k]                                # (TB, 1) f32 in {0, 1}
        h = h + m * (h_new - h)                        # keep old state when padded
        c = c + m * (c_new - c)
        out_ref[k] = (m * h_new).astype(out_ref.dtype) # pad_packed: zeros past len
        return (h, c)

    h, c = jax.lax.fori_loop(0, TS, step, (h_sc[...], c_sc[...]), unroll=True)
    h_sc[...] = h
    c_sc[...] = c

    # Final hidden = state at the last valid step per batch element.
    @pl.when(tblk == n_tblk - 1)
    def _():
        hn_ref[...] = h.astype(hn_ref.dtype)
        cn_ref[...] = c.astype(cn_ref.dtype)


def _masked_lstm_pallas(x_tbi, mask, h0, c0, wih, whh, bias, *, ts, tb=None):
    """x_tbi: (Tp, Bp, I) f32, mask: (Tp, Bp, 1) f32, h0/c0: (Bp, Hp) f32,
    wih: (I, 4Hp) bf16, whh: (Hp, 4Hp) bf16, bias: (1, 4Hp) f32."""
    Tp, Bp, I = x_tbi.shape
    Hp = h0.shape[-1]
    if tb is None:
        tb = Bp                                        # pick Bp//2 etc. on v7x for 2 TCs
    nb, nt = Bp // tb, Tp // ts

    grid_spec = pltpu.PrefetchScalarGridSpec(
        num_scalar_prefetch=0,
        grid=(nb, nt),
        in_specs=[
            pl.BlockSpec((ts, tb, I), lambda b, t: (t, b, 0)),       # x block
            pl.BlockSpec((ts, tb, 1), lambda b, t: (t, b, 0)),       # valid mask
            pl.BlockSpec((tb, Hp), lambda b, t: (b, 0)),             # h0
            pl.BlockSpec((tb, Hp), lambda b, t: (b, 0)),             # c0
            pl.BlockSpec((I, 4 * Hp), lambda b, t: (0, 0)),          # W_ih^T (bf16)
            pl.BlockSpec((Hp, 4 * Hp), lambda b, t: (0, 0)),         # W_hh^T (bf16)
            pl.BlockSpec((1, 4 * Hp), lambda b, t: (0, 0)),          # bias (f32)
        ],
        out_specs=[
            pl.BlockSpec((ts, tb, Hp), lambda b, t: (t, b, 0)),      # outputs
            pl.BlockSpec((tb, Hp), lambda b, t: (b, 0)),             # h_n
            pl.BlockSpec((tb, Hp), lambda b, t: (b, 0)),             # c_n
        ],
        scratch_shapes=[
            pltpu.VMEM((tb, Hp), jnp.float32),           # carried h
            pltpu.VMEM((tb, Hp), jnp.float32),           # carried c
            pltpu.VMEM((ts, tb, 4 * Hp), jnp.float32),   # hoisted input gates
        ],
    )

    out, h_n, c_n = pl.pallas_call(
        _lstm_block_kernel,
        grid_spec=grid_spec,
        out_shape=[
            jax.ShapeDtypeStruct((Tp, Bp, Hp), jnp.float32),
            jax.ShapeDtypeStruct((Bp, Hp), jnp.float32),
            jax.ShapeDtypeStruct((Bp, Hp), jnp.float32),
        ],
        compiler_params=pltpu.CompilerParams(
            dimension_semantics=("parallel", "arbitrary")),   # batch ∥, time serial
    )(x_tbi, mask, h0, c0, wih, whh, bias)
    return out, h_n, c_n


# ----------------------------------------------------------------------------
# Parameter prep: pad H -> Hp (lane multiple) with gate-aligned 4*Hp layout,
# transpose to (in, out) and cast matmul weights to bf16.
# ----------------------------------------------------------------------------
def _prepare_lstm_params(weight_ih, weight_hh, bias_ih, bias_hh, H, Hp):
    I = weight_ih.shape[1]
    wih_t = weight_ih.T.astype(jnp.float32)            # (I, 4H)
    whh_t = weight_hh.T.astype(jnp.float32)            # (H, 4H)
    b = (bias_ih + bias_hh).astype(jnp.float32)        # (4H,)

    wih_p = jnp.zeros((I, 4 * Hp), jnp.float32)
    whh_p = jnp.zeros((Hp, 4 * Hp), jnp.float32)
    b_p = jnp.zeros((1, 4 * Hp), jnp.float32)
    for k in range(4):                                 # gate k -> lanes [k*Hp, k*Hp+H)
        wih_p = wih_p.at[:, k * Hp:k * Hp + H].set(wih_t[:, k * H:(k + 1) * H])
        whh_p = whh_p.at[:H, k * Hp:k * Hp + H].set(whh_t[:, k * H:(k + 1) * H])
        b_p = b_p.at[0, k * Hp:k * Hp + H].set(b[k * H:(k + 1) * H])
    return wih_p.astype(jnp.bfloat16), whh_p.astype(jnp.bfloat16), b_p


# ----------------------------------------------------------------------------
# Wrapper mirroring RecurrentCuDNNWrapper.forward (layer = LSTM, batch_first)
# ----------------------------------------------------------------------------
def recurrent_cudnn_wrapper_forward(params, inputs, hidden=None, seq_len=None,
                                    *, ts_block=8, batch_block=None):
    """params = (weight_ih (4H,I), weight_hh (4H,H), bias_ih (4H,), bias_hh (4H,)),
    inputs: (B, T, I) batch_first (or (B, I) single slice when seq_len is None)."""
    weight_ih, weight_hh, bias_ih, bias_hh = params
    H = weight_hh.shape[1]
    I = weight_ih.shape[1]

    if seq_len is None:
        # TODO(synk): PackedSequence input path has no JAX/Pallas equivalent
        # (CPU-side packed data structure); only the 2-D single-slice path is
        # supported here.
        if inputs.ndim != 2:
            raise ValueError("Without seq_len, inputs must be a single (B, I) slice.")
        B = inputs.shape[0]
        inputs = inputs[:, None, :]                    # add seq dim (batch_first)
        seq_len = jnp.ones((B,), jnp.int32)
        squeeze_out = True
    else:
        B = inputs.shape[0]
        squeeze_out = False
    T = inputs.shape[1]

    if hidden is None:
        h0 = jnp.zeros((1, B, H), jnp.float32)
        c0 = jnp.zeros((1, B, H), jnp.float32)
    else:
        h0, c0 = hidden

    # Padded / aligned problem sizes.
    Hp = ((H + 127) // 128) * 128                      # lane-dense hidden width
    Bp = ((B + 7) // 8) * 8                            # sublane-full batch
    TS = ts_block
    Tp = ((T + TS - 1) // TS) * TS

    wih_p, whh_p, b_p = _prepare_lstm_params(weight_ih, weight_hh,
                                             bias_ih, bias_hh, H, Hp)

    # Time-major input, padded (T, B) -> (Tp, Bp); padded entries are inert.
    x_tbi = jnp.transpose(inputs.astype(jnp.float32), (1, 0, 2))
    x_tbi = jnp.pad(x_tbi, ((0, Tp - T), (0, Bp - B), (0, 0)))

    # Precomputed validity mask (padded batch rows get seq_len = 0).
    seq_len = jnp.asarray(seq_len, jnp.int32)
    len_pad = jnp.pad(seq_len, (0, Bp - B))
    mask = (jnp.arange(Tp)[:, None] < len_pad[None, :]).astype(jnp.float32)[..., None]

    h0_p = jnp.pad(h0[0].astype(jnp.float32), ((0, Bp - B), (0, Hp - H)))
    c0_p = jnp.pad(c0[0].astype(jnp.float32), ((0, Bp - B), (0, Hp - H)))

    out_p, hn_p, cn_p = _masked_lstm_pallas(
        x_tbi, mask, h0_p, c0_p, wih_p, whh_p, b_p, ts=TS, tb=batch_block)

    outputs = jnp.transpose(out_p[:T, :B, :H], (1, 0, 2))   # (B, T, H)
    h_n = hn_p[:B, :H][None]                                 # (1, B, H)
    c_n = cn_p[:B, :H][None]
    if squeeze_out:
        outputs = outputs[:, 0, :]
    return outputs, (h_n, c_n)


# ----------------------------------------------------------------------------
# Pure-JAX f32 reference (masked LSTM == pack/pad semantics) for verification
# ----------------------------------------------------------------------------
def _lstm_ref(x_bti, seq_len, h0, c0, weight_ih, weight_hh, bias_ih, bias_hh):
    B, T, I = x_bti.shape
    H = weight_hh.shape[1]
    wih_t, whh_t = weight_ih.T, weight_hh.T
    bias = bias_ih + bias_hh

    def step(carry, inp):
        h, c = carry
        xt, t = inp
        gates = xt @ wih_t + h @ whh_t + bias
        i = jax.nn.sigmoid(gates[:, :H])
        f = jax.nn.sigmoid(gates[:, H:2 * H])
        g = jnp.tanh(gates[:, 2 * H:3 * H])
        o = jax.nn.sigmoid(gates[:, 3 * H:])
        cn = f * c + i * g
        hn = o * jnp.tanh(cn)
        active = (t < seq_len)[:, None]
        return ((jnp.where(active, hn, h), jnp.where(active, cn, c)),
                jnp.where(active, hn, 0.0))

    (hT, cT), outs = jax.lax.scan(
        step, (h0, c0),
        (jnp.transpose(x_bti, (1, 0, 2)), jnp.arange(T)))
    return jnp.transpose(outs, (1, 0, 2)), hT, cT


if __name__ == "__main__":
    B, T, I, H = 4, 8, 16, 32

    key = jax.random.PRNGKey(0)
    k_x, k_wih, k_whh, k_bi, k_bh, k_h0, k_c0 = jax.random.split(key, 7)
    scale = 1.0 / np.sqrt(H)   # PyTorch RNNBase default init range

    # Parameters of the wrapped nn.LSTM(I, H, num_layers=1, batch_first=True)
    weight_ih = jax.random.uniform(k_wih, (4 * H, I), jnp.float32, -scale, scale)
    weight_hh = jax.random.uniform(k_whh, (4 * H, H), jnp.float32, -scale, scale)
    bias_ih = jax.random.uniform(k_bi, (4 * H,), jnp.float32, -scale, scale)
    bias_hh = jax.random.uniform(k_bh, (4 * H,), jnp.float32, -scale, scale)
    params = (weight_ih, weight_hh, bias_ih, bias_hh)

    # Inputs (batch_first, like the PyTorch module) + variable sequence lengths
    x = jax.random.normal(k_x, (B, T, I), jnp.float32)
    seq_len = jnp.array([8, 3, 5, 1], jnp.int32)
    h0 = jax.random.normal(k_h0, (1, B, H), jnp.float32)
    c0 = jax.random.normal(k_c0, (1, B, H), jnp.float32)

    outputs, (h_n, c_n) = recurrent_cudnn_wrapper_forward(
        params, x, hidden=(h0, c0), seq_len=seq_len)
    jax.block_until_ready((outputs, h_n, c_n))

    # Verify against pure-JAX f32 reference (bf16 MXU operands -> loose tol).
    out_ref, h_ref, c_ref = _lstm_ref(x, seq_len, h0[0], c0[0], *params)
    np.testing.assert_allclose(np.asarray(outputs), np.asarray(out_ref),
                               rtol=2e-2, atol=2e-2)
    np.testing.assert_allclose(np.asarray(h_n[0]), np.asarray(h_ref),
                               rtol=2e-2, atol=2e-2)
    np.testing.assert_allclose(np.asarray(c_n[0]), np.asarray(c_ref),
                               rtol=2e-2, atol=2e-2)

    assert outputs.shape == (B, T, H) and h_n.shape == (1, B, H) and c_n.shape == (1, B, H)
    print("KERNEL_OK")
</pallas_src>

<mosaic_0001>
module attributes {stable_mosaic.version = 11 : i64} {
  func.func @_lstm_block_kernel(%arg0: i32, %arg1: i32, %arg2: memref<8x8x16xf32, #tpu.memory_space<vmem>>, %arg3: memref<8x8x1xf32, #tpu.memory_space<vmem>>, %arg4: memref<8x128xf32, #tpu.memory_space<vmem>>, %arg5: memref<8x128xf32, #tpu.memory_space<vmem>>, %arg6: memref<16x512xbf16, #tpu.memory_space<vmem>>, %arg7: memref<128x512xbf16, #tpu.memory_space<vmem>>, %arg8: memref<1x512xf32, #tpu.memory_space<vmem>>, %arg9: memref<8x8x128xf32, #tpu.memory_space<vmem>>, %arg10: memref<8x128xf32, #tpu.memory_space<vmem>>, %arg11: memref<8x128xf32, #tpu.memory_space<vmem>>, %arg12: memref<8x128xf32, #tpu.memory_space<vmem>>, %arg13: memref<8x128xf32, #tpu.memory_space<vmem>>, %arg14: memref<8x8x512xf32, #tpu.memory_space<vmem>>) attributes {dimension_semantics = [#tpu.dimension_semantics<parallel>, #tpu.dimension_semantics<arbitrary>], iteration_bounds = array<i64: 1, 1>, scalar_prefetch = 0 : i64, scratch_operands = 3 : i64, tpu.core_type = #tpu.core_type<tc>, window_params = [{transform_indices = @transform_0, window_bounds = array<i64: 8, 8, 16>}, {transform_indices = @transform_1, window_bounds = array<i64: 8, 8, 1>}, {transform_indices = @transform_2, window_bounds = array<i64: 8, 128>}, {transform_indices = @transform_3, window_bounds = array<i64: 8, 128>}, {pipeline_mode = #tpu.pipeline_mode<synchronous>, transform_indices = @transform_4, window_bounds = array<i64: 16, 512>}, {pipeline_mode = #tpu.pipeline_mode<synchronous>, transform_indices = @transform_5, window_bounds = array<i64: 128, 512>}, {pipeline_mode = #tpu.pipeline_mode<synchronous>, transform_indices = @transform_6, window_bounds = array<i64: 1, 512>}, {transform_indices = @transform_7, window_bounds = array<i64: 8, 8, 128>}, {transform_indices = @transform_8, window_bounds = array<i64: 8, 128>}, {transform_indices = @transform_9, window_bounds = array<i64: 8, 128>}]} {
    %c0_i32 = arith.constant 0 : i32
    %0 = arith.cmpi eq, %arg1, %c0_i32 : i32
    %1 = arith.extui %0 : i1 to i32
    %c0_i32_0 = arith.constant 0 : i32
    %2 = arith.cmpi ne, %1, %c0_i32_0 : i32
    scf.if %2 {
      %c0_103 = arith.constant 0 : index
      %c0_104 = arith.constant 0 : index
      %405 = vector.load %arg4[%c0_103, %c0_104] : memref<8x128xf32, #tpu.memory_space<vmem>>, vector<8x128xf32>
      %c0_105 = arith.constant 0 : index
      %c0_106 = arith.constant 0 : index
      %406 = vector.load %arg12[%c0_105, %c0_106] : memref<8x128xf32, #tpu.memory_space<vmem>>, vector<8x128xf32>
      tpu.vector_store %arg12[%c0_105, %c0_106], %405 {strides = array<i32>} : memref<8x128xf32, #tpu.memory_space<vmem>>, vector<8x128xf32>,
      %c0_107 = arith.constant 0 : index
      %c0_108 = arith.constant 0 : index
      %407 = vector.load %arg5[%c0_107, %c0_108] : memref<8x128xf32, #tpu.memory_space<vmem>>, vector<8x128xf32>
      %c0_109 = arith.constant 0 : index
      %c0_110 = arith.constant 0 : index
      %408 = vector.load %arg13[%c0_109, %c0_110] : memref<8x128xf32, #tpu.memory_space<vmem>>, vector<8x128xf32>
      tpu.vector_store %arg13[%c0_109, %c0_110], %407 {strides = array<i32>} : memref<8x128xf32, #tpu.memory_space<vmem>>, vector<8x128xf32>,
    } else {
    }
    %c0 = arith.constant 0 : index
    %c0_1 = arith.constant 0 : index
    %c0_2 = arith.constant 0 : index
    %3 = vector.load %arg2[%c0, %c0_1, %c0_2] : memref<8x8x16xf32, #tpu.memory_space<vmem>>, vector<8x8x16xf32>
    %4 = vector.shape_cast %3 : vector<8x8x16xf32> to vector<64x16xf32>
    %5 = arith.truncf %4 : vector<64x16xf32> to vector<64x16xbf16>
    %c0_3 = arith.constant 0 : index
    %c0_4 = arith.constant 0 : index
    %6 = vector.load %arg6[%c0_3, %c0_4] : memref<16x512xbf16, #tpu.memory_space<vmem>>, vector<16x512xbf16>
    %cst = arith.constant dense<0.000000e+00> : vector<64x512xf32>
    %7 = tpu.matmul %5, %6, %cst {dimension_numbers = #tpu.dot_dimension_numbers<[1], [0], [0], [1], [0, 0, 1, 1], [], []>} : vector<64x16xbf16>, vector<16x512xbf16>, vector<64x512xf32> -> vector<64x512xf32>
    %c0_5 = arith.constant 0 : index
    %c0_6 = arith.constant 0 : index
    %8 = vector.load %arg8[%c0_5, %c0_6] : memref<1x512xf32, #tpu.memory_space<vmem>>, vector<1x512xf32>
    %9 = vector.broadcast %8 : vector<1x512xf32> to vector<64x512xf32>
    %10 = arith.addf %7, %9 : vector<64x512xf32>
    %11 = vector.shape_cast %10 : vector<64x512xf32> to vector<8x8x512xf32>
    %c0_7 = arith.constant 0 : index
    %c0_8 = arith.constant 0 : index
    %c0_9 = arith.constant 0 : index
    %12 = vector.load %arg14[%c0_7, %c0_8, %c0_9] : memref<8x8x512xf32, #tpu.memory_space<vmem>>, vector<8x8x512xf32>
    tpu.vector_store %arg14[%c0_7, %c0_8, %c0_9], %11 {strides = array<i32>} : memref<8x8x512xf32, #tpu.memory_space<vmem>>, vector<8x8x512xf32>,
    %c0_10 = arith.constant 0 : index
    %c0_11 = arith.constant 0 : index
    %13 = vector.load %arg7[%c0_10, %c0_11] : memref<128x512xbf16, #tpu.memory_space<vmem>>, vector<128x512xbf16>
    %c0_12 = arith.constant 0 : index
    %c0_13 = arith.constant 0 : index
    %14 = vector.load %arg12[%c0_12, %c0_13] : memref<8x128xf32, #tpu.memory_space<vmem>>, vector<8x128xf32>
    %c0_14 = arith.constant 0 : index
    %c0_15 = arith.constant 0 : index
    %15 = vector.load %arg13[%c0_14, %c0_15] : memref<8x128xf32, #tpu.memory_space<vmem>>, vector<8x128xf32>
    %c0_i32_16 = arith.constant 0 : i32
    %16 = arith.index_cast %c0_i32_16 : i32 to index
    %c0_17 = arith.constant 0 : index
    %c0_18 = arith.constant 0 : index
    %17 = vector.load %arg14[%16, %c0_17, %c0_18] : memref<8x8x512xf32, #tpu.memory_space<vmem>>, vector<1x8x512xf32>
    %18 = vector.shape_cast %17 : vector<1x8x512xf32> to vector<8x512xf32>
    %19 = arith.truncf %14 : vector<8x128xf32> to vector<8x128xbf16>
    %cst_19 = arith.constant dense<0.000000e+00> : vector<8x512xf32>
    %20 = tpu.matmul %19, %13, %cst_19 {dimension_numbers = #tpu.dot_dimension_numbers<[1], [0], [0], [1], [0, 0, 1, 1], [], []>} : vector<8x128xbf16>, vector<128x512xbf16>, vector<8x512xf32> -> vector<8x512xf32>
    %21 = arith.addf %18, %20 : vector<8x512xf32>
    %22 = vector.extract_strided_slice %21 {offsets = [0, 0], sizes = [8, 128], strides = [1, 1]} : vector<8x512xf32> to vector<8x128xf32>
    %23 = arith.negf %22 : vector<8x128xf32>
    %24 = math.exp %23 : vector<8x128xf32>
    %cst_20 = arith.constant 1.000000e+00 : f32
    %25 = vector.broadcast %cst_20 : f32 to vector<8x128xf32>
    %26 = arith.addf %25, %24 : vector<8x128xf32>
    %27 = arith.divf %25, %26 : vector<8x128xf32>
    %28 = vector.extract_strided_slice %21 {offsets = [0, 128], sizes = [8, 128], strides = [1, 1]} : vector<8x512xf32> to vector<8x128xf32>
    %29 = arith.negf %28 : vector<8x128xf32>
    %30 = math.exp %29 : vector<8x128xf32>
    %cst_21 = arith.constant 1.000000e+00 : f32
    %31 = vector.broadcast %cst_21 : f32 to vector<8x128xf32>
    %32 = arith.addf %31, %30 : vector<8x128xf32>
    %33 = arith.divf %31, %32 : vector<8x128xf32>
    %34 = vector.extract_strided_slice %21 {offsets = [0, 256], sizes = [8, 128], strides = [1, 1]} : vector<8x512xf32> to vector<8x128xf32>
    %35 = math.tanh %34 : vector<8x128xf32>
    %36 = vector.extract_strided_slice %21 {offsets = [0, 384], sizes = [8, 128], strides = [1, 1]} : vector<8x512xf32> to vector<8x128xf32>
    %37 = arith.negf %36 : vector<8x128xf32>
    %38 = math.exp %37 : vector<8x128xf32>
    %cst_22 = arith.constant 1.000000e+00 : f32
    %39 = vector.broadcast %cst_22 : f32 to vector<8x128xf32>
    %40 = arith.addf %39, %38 : vector<8x128xf32>
    %41 = arith.divf %39, %40 : vector<8x128xf32>
    %42 = arith.mulf %33, %15 : vector<8x128xf32>
    %43 = arith.mulf %27, %35 : vector<8x128xf32>
    %44 = arith.addf %42, %43 : vector<8x128xf32>
    %45 = math.tanh %44 : vector<8x128xf32>
    %46 = arith.mulf %41, %45 : vector<8x128xf32>
    %47 = arith.index_cast %c0_i32_16 : i32 to index
    %c0_23 = arith.constant 0 : index
    %c0_24 = arith.constant 0 : index
    %48 = vector.load %arg3[%47, %c0_23, %c0_24] : memref<8x8x1xf32, #tpu.memory_space<vmem>>, vector<1x8x1xf32>
    %49 = vector.shape_cast %48 : vector<1x8x1xf32> to vector<8x1xf32>
    %50 = arith.subf %46, %14 : vector<8x128xf32>
    %51 = vector.broadcast %49 : vector<8x1xf32> to vector<8x128xf32>
    %52 = arith.mulf %51, %50 : vector<8x128xf32>
    %53 = arith.addf %14, %52 : vector<8x128xf32>
    %54 = arith.subf %44, %15 : vector<8x128xf32>
    %55 = vector.broadcast %49 : vector<8x1xf32> to vector<8x128xf32>
    %56 = arith.mulf %55, %54 : vector<8x128xf32>
    %57 = arith.addf %15, %56 : vector<8x128xf32>
    %58 = vector.broadcast %49 : vector<8x1xf32> to vector<8x128xf32>
    %59 = arith.mulf %58, %46 : vector<8x128xf32>
    %60 = arith.index_cast %c0_i32_16 : i32 to index
    %c0_25 = arith.constant 0 : index
    %c0_26 = arith.constant 0 : index
    %61 = vector.load %arg9[%60, %c0_25, %c0_26] : memref<8x8x128xf32, #tpu.memory_space<vmem>>, vector<1x8x128xf32>
    %62 = vector.shape_cast %61 : vector<1x8x128xf32> to vector<8x128xf32>
    %63 = vector.shape_cast %59 : vector<8x128xf32> to vector<1x8x128xf32>
    tpu.vector_store %arg9[%60, %c0_25, %c0_26], %63 {strides = array<i32>} : memref<8x8x128xf32, #tpu.memory_space<vmem>>, vector<1x8x128xf32>,
    %c1_i32 = arith.constant 1 : i32
    %64 = arith.index_cast %c1_i32 : i32 to index
    %c0_27 = arith.constant 0 : index
    %c0_28 = arith.constant 0 : index
    %65 = vector.load %arg14[%64, %c0_27, %c0_28] : memref<8x8x512xf32, #tpu.memory_space<vmem>>, vector<1x8x512xf32>
    %66 = vector.shape_cast %65 : vector<1x8x512xf32> to vector<8x512xf32>
    %67 = arith.truncf %53 : vector<8x128xf32> to vector<8x128xbf16>
    %cst_29 = arith.constant dense<0.000000e+00> : vector<8x512xf32>
    %68 = tpu.matmul %67, %13, %cst_29 {dimension_numbers = #tpu.dot_dimension_numbers<[1], [0], [0], [1], [0, 0, 1, 1], [], []>} : vector<8x128xbf16>, vector<128x512xbf16>, vector<8x512xf32> -> vector<8x512xf32>
    %69 = arith.addf %66, %68 : vector<8x512xf32>
    %70 = vector.extract_strided_slice %69 {offsets = [0, 0], sizes = [8, 128], strides = [1, 1]} : vector<8x512xf32> to vector<8x128xf32>
    %71 = arith.negf %70 : vector<8x128xf32>
    %72 = math.exp %71 : vector<8x128xf32>
    %cst_30 = arith.constant 1.000000e+00 : f32
    %73 = vector.broadcast %cst_30 : f32 to vector<8x128xf32>
    %74 = arith.addf %73, %72 : vector<8x128xf32>
    %75 = arith.divf %73, %74 : vector<8x128xf32>
    %76 = vector.extract_strided_slice %69 {offsets = [0, 128], sizes = [8, 128], strides = [1, 1]} : vector<8x512xf32> to vector<8x128xf32>
    %77 = arith.negf %76 : vector<8x128xf32>
    %78 = math.exp %77 : vector<8x128xf32>
    %cst_31 = arith.constant 1.000000e+00 : f32
    %79 = vector.broadcast %cst_31 : f32 to vector<8x128xf32>
    %80 = arith.addf %79, %78 : vector<8x128xf32>
    %81 = arith.divf %79, %80 : vector<8x128xf32>
    %82 = vector.extract_strided_slice %69 {offsets = [0, 256], sizes = [8, 128], strides = [1, 1]} : vector<8x512xf32> to vector<8x128xf32>
    %83 = math.tanh %82 : vector<8x128xf32>
    %84 = vector.extract_strided_slice %69 {offsets = [0, 384], sizes = [8, 128], strides = [1, 1]} : vector<8x512xf32> to vector<8x128xf32>
    %85 = arith.negf %84 : vector<8x128xf32>
    %86 = math.exp %85 : vector<8x128xf32>
    %cst_32 = arith.constant 1.000000e+00 : f32
    %87 = vector.broadcast %cst_32 : f32 to vector<8x128xf32>
    %88 = arith.addf %87, %86 : vector<8x128xf32>
    %89 = arith.divf %87, %88 : vector<8x128xf32>
    %90 = arith.mulf %81, %57 : vector<8x128xf32>
    %91 = arith.mulf %75, %83 : vector<8x128xf32>
    %92 = arith.addf %90, %91 : vector<8x128xf32>
    %93 = math.tanh %92 : vector<8x128xf32>
    %94 = arith.mulf %89, %93 : vector<8x128xf32>
    %95 = arith.index_cast %c1_i32 : i32 to index
    %c0_33 = arith.constant 0 : index
    %c0_34 = arith.constant 0 : index
    %96 = vector.load %arg3[%95, %c0_33, %c0_34] : memref<8x8x1xf32, #tpu.memory_space<vmem>>, vector<1x8x1xf32>
    %97 = vector.shape_cast %96 : vector<1x8x1xf32> to vector<8x1xf32>
    %98 = arith.subf %94, %53 : vector<8x128xf32>
    %99 = vector.broadcast %97 : vector<8x1xf32> to vector<8x128xf32>
    %100 = arith.mulf %99, %98 : vector<8x128xf32>
    %101 = arith.addf %53, %100 : vector<8x128xf32>
    %102 = arith.subf %92, %57 : vector<8x128xf32>
    %103 = vector.broadcast %97 : vector<8x1xf32> to vector<8x128xf32>
    %104 = arith.mulf %103, %102 : vector<8x128xf32>
    %105 = arith.addf %57, %104 : vector<8x128xf32>
    %106 = vector.broadcast %97 : vector<8x1xf32> to vector<8x128xf32>
    %107 = arith.mulf %106, %94 : vector<8x128xf32>
    %108 = arith.index_cast %c1_i32 : i32 to index
    %c0_35 = arith.constant 0 : index
    %c0_36 = arith.constant 0 : index
    %109 = vector.load %arg9[%108, %c0_35, %c0_36] : memref<8x8x128xf32, #tpu.memory_space<vmem>>, vector<1x8x128xf32>
    %110 = vector.shape_cast %109 : vector<1x8x128xf32> to vector<8x128xf32>
    %111 = vector.shape_cast %107 : vector<8x128xf32> to vector<1x8x128xf32>
    tpu.vector_store %arg9[%108, %c0_35, %c0_36], %111 {strides = array<i32>} : memref<8x8x128xf32, #tpu.memory_space<vmem>>, vector<1x8x128xf32>,
    %c2_i32 = arith.constant 2 : i32
    %112 = arith.index_cast %c2_i32 : i32 to index
    %c0_37 = arith.constant 0 : index
    %c0_38 = arith.constant 0 : index
    %113 = vector.load %arg14[%112, %c0_37, %c0_38] : memref<8x8x512xf32, #tpu.memory_space<vmem>>, vector<1x8x512xf32>
    %114 = vector.shape_cast %113 : vector<1x8x512xf32> to vector<8x512xf32>
    %115 = arith.truncf %101 : vector<8x128xf32> to vector<8x128xbf16>
    %cst_39 = arith.constant dense<0.000000e+00> : vector<8x512xf32>
    %116 = tpu.matmul %115, %13, %cst_39 {dimension_numbers = #tpu.dot_dimension_numbers<[1], [0], [0], [1], [0, 0, 1, 1], [], []>} : vector<8x128xbf16>, vector<128x512xbf16>, vector<8x512xf32> -> vector<8x512xf32>
    %117 = arith.addf %114, %116 : vector<8x512xf32>
    %118 = vector.extract_strided_slice %117 {offsets = [0, 0], sizes = [8, 128], strides = [1, 1]} : vector<8x512xf32> to vector<8x128xf32>
    %119 = arith.negf %118 : vector<8x128xf32>
    %120 = math.exp %119 : vector<8x128xf32>
    %cst_40 = arith.constant 1.000000e+00 : f32
    %121 = vector.broadcast %cst_40 : f32 to vector<8x128xf32>
    %122 = arith.addf %121, %120 : vector<8x128xf32>
    %123 = arith.divf %121, %122 : vector<8x128xf32>
    %124 = vector.extract_strided_slice %117 {offsets = [0, 128], sizes = [8, 128], strides = [1, 1]} : vector<8x512xf32> to vector<8x128xf32>
    %125 = arith.negf %124 : vector<8x128xf32>
    %126 = math.exp %125 : vector<8x128xf32>
    %cst_41 = arith.constant 1.000000e+00 : f32
    %127 = vector.broadcast %cst_41 : f32 to vector<8x128xf32>
    %128 = arith.addf %127, %126 : vector<8x128xf32>
    %129 = arith.divf %127, %128 : vector<8x128xf32>
    %130 = vector.extract_strided_slice %117 {offsets = [0, 256], sizes = [8, 128], strides = [1, 1]} : vector<8x512xf32> to vector<8x128xf32>
    %131 = math.tanh %130 : vector<8x128xf32>
    %132 = vector.extract_strided_slice %117 {offsets = [0, 384], sizes = [8, 128], strides = [1, 1]} : vector<8x512xf32> to vector<8x128xf32>
    %133 = arith.negf %132 : vector<8x128xf32>
    %134 = math.exp %133 : vector<8x128xf32>
    %cst_42 = arith.constant 1.000000e+00 : f32
    %135 = vector.broadcast %cst_42 : f32 to vector<8x128xf32>
    %136 = arith.addf %135, %134 : vector<8x128xf32>
    %137 = arith.divf %135, %136 : vector<8x128xf32>
    %138 = arith.mulf %129, %105 : vector<8x128xf32>
    %139 = arith.mulf %123, %131 : vector<8x128xf32>
    %140 = arith.addf %138, %139 : vector<8x128xf32>
    %141 = math.tanh %140 : vector<8x128xf32>
    %142 = arith.mulf %137, %141 : vector<8x128xf32>
    %143 = arith.index_cast %c2_i32 : i32 to index
    %c0_43 = arith.constant 0 : index
    %c0_44 = arith.constant 0 : index
    %144 = vector.load %arg3[%143, %c0_43, %c0_44] : memref<8x8x1xf32, #tpu.memory_space<vmem>>, vector<1x8x1xf32>
    %145 = vector.shape_cast %144 : vector<1x8x1xf32> to vector<8x1xf32>
    %146 = arith.subf %142, %101 : vector<8x128xf32>
    %147 = vector.broadcast %145 : vector<8x1xf32> to vector<8x128xf32>
    %148 = arith.mulf %147, %146 : vector<8x128xf32>
    %149 = arith.addf %101, %148 : vector<8x128xf32>
    %150 = arith.subf %140, %105 : vector<8x128xf32>
    %151 = vector.broadcast %145 : vector<8x1xf32> to vector<8x128xf32>
    %152 = arith.mulf %151, %150 : vector<8x128xf32>
    %153 = arith.addf %105, %152 : vector<8x128xf32>
    %154 = vector.broadcast %145 : vector<8x1xf32> to vector<8x128xf32>
    %155 = arith.mulf %154, %142 : vector<8x128xf32>
    %156 = arith.index_cast %c2_i32 : i32 to index
    %c0_45 = arith.constant 0 : index
    %c0_46 = arith.constant 0 : index
    %157 = vector.load %arg9[%156, %c0_45, %c0_46] : memref<8x8x128xf32, #tpu.memory_space<vmem>>, vector<1x8x128xf32>
    %158 = vector.shape_cast %157 : vector<1x8x128xf32> to vector<8x128xf32>
    %159 = vector.shape_cast %155 : vector<8x128xf32> to vector<1x8x128xf32>
    tpu.vector_store %arg9[%156, %c0_45, %c0_46], %159 {strides = array<i32>} : memref<8x8x128xf32, #tpu.memory_space<vmem>>, vector<1x8x128xf32>,
    %c3_i32 = arith.constant 3 : i32
    %160 = arith.index_cast %c3_i32 : i32 to index
    %c0_47 = arith.constant 0 : index
    %c0_48 = arith.constant 0 : index
    %161 = vector.load %arg14[%160, %c0_47, %c0_48] : memref<8x8x512xf32, #tpu.memory_space<vmem>>, vector<1x8x512xf32>
    %162 = vector.shape_cast %161 : vector<1x8x512xf32> to vector<8x512xf32>
    %163 = arith.truncf %149 : vector<8x128xf32> to vector<8x128xbf16>
    %cst_49 = arith.constant dense<0.000000e+00> : vector<8x512xf32>
    %164 = tpu.matmul %163, %13, %cst_49 {dimension_numbers = #tpu.dot_dimension_numbers<[1], [0], [0], [1], [0, 0, 1, 1], [], []>} : vector<8x128xbf16>, vector<128x512xbf16>, vector<8x512xf32> -> vector<8x512xf32>
    %165 = arith.addf %162, %164 : vector<8x512xf32>
    %166 = vector.extract_strided_slice %165 {offsets = [0, 0], sizes = [8, 128], strides = [1, 1]} : vector<8x512xf32> to vector<8x128xf32>
    %167 = arith.negf %166 : vector<8x128xf32>
    %168 = math.exp %167 : vector<8x128xf32>
    %cst_50 = arith.constant 1.000000e+00 : f32
    %169 = vector.broadcast %cst_50 : f32 to vector<8x128xf32>
    %170 = arith.addf %169, %168 : vector<8x128xf32>
    %171 = arith.divf %169, %170 : vector<8x128xf32>
    %172 = vector.extract_strided_slice %165 {offsets = [0, 128], sizes = [8, 128], strides = [1, 1]} : vector<8x512xf32> to vector<8x128xf32>
    %173 = arith.negf %172 : vector<8x128xf32>
    %174 = math.exp %173 : vector<8x128xf32>
    %cst_51 = arith.constant 1.000000e+00 : f32
    %175 = vector.broadcast %cst_51 : f32 to vector<8x128xf32>
    %176 = arith.addf %175, %174 : vector<8x128xf32>
    %177 = arith.divf %175, %176 : vector<8x128xf32>
    %178 = vector.extract_strided_slice %165 {offsets = [0, 256], sizes = [8, 128], strides = [1, 1]} : vector<8x512xf32> to vector<8x128xf32>
    %179 = math.tanh %178 : vector<8x128xf32>
    %180 = vector.extract_strided_slice %165 {offsets = [0, 384], sizes = [8, 128], strides = [1, 1]} : vector<8x512xf32> to vector<8x128xf32>
    %181 = arith.negf %180 : vector<8x128xf32>
    %182 = math.exp %181 : vector<8x128xf32>
    %cst_52 = arith.constant 1.000000e+00 : f32
    %183 = vector.broadcast %cst_52 : f32 to vector<8x128xf32>
    %184 = arith.addf %183, %182 : vector<8x128xf32>
    %185 = arith.divf %183, %184 : vector<8x128xf32>
    %186 = arith.mulf %177, %153 : vector<8x128xf32>
    %187 = arith.mulf %171, %179 : vector<8x128xf32>
    %188 = arith.addf %186, %187 : vector<8x128xf32>
    %189 = math.tanh %188 : vector<8x128xf32>
    %190 = arith.mulf %185, %189 : vector<8x128xf32>
    %191 = arith.index_cast %c3_i32 : i32 to index
    %c0_53 = arith.constant 0 : index
    %c0_54 = arith.constant 0 : index
    %192 = vector.load %arg3[%191, %c0_53, %c0_54] : memref<8x8x1xf32, #tpu.memory_space<vmem>>, vector<1x8x1xf32>
    %193 = vector.shape_cast %192 : vector<1x8x1xf32> to vector<8x1xf32>
    %194 = arith.subf %190, %149 : vector<8x128xf32>
    %195 = vector.broadcast %193 : vector<8x1xf32> to vector<8x128xf32>
    %196 = arith.mulf %195, %194 : vector<8x128xf32>
    %197 = arith.addf %149, %196 : vector<8x128xf32>
    %198 = arith.subf %188, %153 : vector<8x128xf32>
    %199 = vector.broadcast %193 : vector<8x1xf32> to vector<8x128xf32>
    %200 = arith.mulf %199, %198 : vector<8x128xf32>
    %201 = arith.addf %153, %200 : vector<8x128xf32>
    %202 = vector.broadcast %193 : vector<8x1xf32> to vector<8x128xf32>
    %203 = arith.mulf %202, %190 : vector<8x128xf32>
    %204 = arith.index_cast %c3_i32 : i32 to index
    %c0_55 = arith.constant 0 : index
    %c0_56 = arith.constant 0 : index
    %205 = vector.load %arg9[%204, %c0_55, %c0_56] : memref<8x8x128xf32, #tpu.memory_space<vmem>>, vector<1x8x128xf32>
    %206 = vector.shape_cast %205 : vector<1x8x128xf32> to vector<8x128xf32>
    %207 = vector.shape_cast %203 : vector<8x128xf32> to vector<1x8x128xf32>
    tpu.vector_store %arg9[%204, %c0_55, %c0_56], %207 {strides = array<i32>} : memref<8x8x128xf32, #tpu.memory_space<vmem>>, vector<1x8x128xf32>,
    %c4_i32 = arith.constant 4 : i32
    %208 = arith.index_cast %c4_i32 : i32 to index
    %c0_57 = arith.constant 0 : index
    %c0_58 = arith.constant 0 : index
    %209 = vector.load %arg14[%208, %c0_57, %c0_58] : memref<8x8x512xf32, #tpu.memory_space<vmem>>, vector<1x8x512xf32>
    %210 = vector.shape_cast %209 : vector<1x8x512xf32> to vector<8x512xf32>
    %211 = arith.truncf %197 : vector<8x128xf32> to vector<8x128xbf16>
    %cst_59 = arith.constant dense<0.000000e+00> : vector<8x512xf32>
    %212 = tpu.matmul %211, %13, %cst_59 {dimension_numbers = #tpu.dot_dimension_numbers<[1], [0], [0], [1], [0, 0, 1, 1], [], []>} : vector<8x128xbf16>, vector<128x512xbf16>, vector<8x512xf32> -> vector<8x512xf32>
    %213 = arith.addf %210, %212 : vector<8x512xf32>
    %214 = vector.extract_strided_slice %213 {offsets = [0, 0], sizes = [8, 128], strides = [1, 1]} : vector<8x512xf32> to vector<8x128xf32>
    %215 = arith.negf %214 : vector<8x128xf32>
    %216 = math.exp %215 : vector<8x128xf32>
    %cst_60 = arith.constant 1.000000e+00 : f32
    %217 = vector.broadcast %cst_60 : f32 to vector<8x128xf32>
    %218 = arith.addf %217, %216 : vector<8x128xf32>
    %219 = arith.divf %217, %218 : vector<8x128xf32>
    %220 = vector.extract_strided_slice %213 {offsets = [0, 128], sizes = [8, 128], strides = [1, 1]} : vector<8x512xf32> to vector<8x128xf32>
    %221 = arith.negf %220 : vector<8x128xf32>
    %222 = math.exp %221 : vector<8x128xf32>
    %cst_61 = arith.constant 1.000000e+00 : f32
    %223 = vector.broadcast %cst_61 : f32 to vector<8x128xf32>
    %224 = arith.addf %223, %222 : vector<8x128xf32>
    %225 = arith.divf %223, %224 : vector<8x128xf32>
    %226 = vector.extract_strided_slice %213 {offsets = [0, 256], sizes = [8, 128], strides = [1, 1]} : vector<8x512xf32> to vector<8x128xf32>
    %227 = math.tanh %226 : vector<8x128xf32>
    %228 = vector.extract_strided_slice %213 {offsets = [0, 384], sizes = [8, 128], strides = [1, 1]} : vector<8x512xf32> to vector<8x128xf32>
    %229 = arith.negf %228 : vector<8x128xf32>
    %230 = math.exp %229 : vector<8x128xf32>
    %cst_62 = arith.constant 1.000000e+00 : f32
    %231 = vector.broadcast %cst_62 : f32 to vector<8x128xf32>
    %232 = arith.addf %231, %230 : vector<8x128xf32>
    %233 = arith.divf %231, %232 : vector<8x128xf32>
    %234 = arith.mulf %225, %201 : vector<8x128xf32>
    %235 = arith.mulf %219, %227 : vector<8x128xf32>
    %236 = arith.addf %234, %235 : vector<8x128xf32>
    %237 = math.tanh %236 : vector<8x128xf32>
    %238 = arith.mulf %233, %237 : vector<8x128xf32>
    %239 = arith.index_cast %c4_i32 : i32 to index
    %c0_63 = arith.constant 0 : index
    %c0_64 = arith.constant 0 : index
    %240 = vector.load %arg3[%239, %c0_63, %c0_64] : memref<8x8x1xf32, #tpu.memory_space<vmem>>, vector<1x8x1xf32>
    %241 = vector.shape_cast %240 : vector<1x8x1xf32> to vector<8x1xf32>
    %242 = arith.subf %238, %197 : vector<8x128xf32>
    %243 = vector.broadcast %241 : vector<8x1xf32> to vector<8x128xf32>
    %244 = arith.mulf %243, %242 : vector<8x128xf32>
    %245 = arith.addf %197, %244 : vector<8x128xf32>
    %246 = arith.subf %236, %201 : vector<8x128xf32>
    %247 = vector.broadcast %241 : vector<8x1xf32> to vector<8x128xf32>
    %248 = arith.mulf %247, %246 : vector<8x128xf32>
    %249 = arith.addf %201, %248 : vector<8x128xf32>
    %250 = vector.broadcast %241 : vector<8x1xf32> to vector<8x128xf32>
    %251 = arith.mulf %250, %238 : vector<8x128xf32>
    %252 = arith.index_cast %c4_i32 : i32 to index
    %c0_65 = arith.constant 0 : index
    %c0_66 = arith.constant 0 : index
    %253 = vector.load %arg9[%252, %c0_65, %c0_66] : memref<8x8x128xf32, #tpu.memory_space<vmem>>, vector<1x8x128xf32>
    %254 = vector.shape_cast %253 : vector<1x8x128xf32> to vector<8x128xf32>
    %255 = vector.shape_cast %251 : vector<8x128xf32> to vector<1x8x128xf32>
    tpu.vector_store %arg9[%252, %c0_65, %c0_66], %255 {strides = array<i32>} : memref<8x8x128xf32, #tpu.memory_space<vmem>>, vector<1x8x128xf32>,
    %c5_i32 = arith.constant 5 : i32
    %256 = arith.index_cast %c5_i32 : i32 to index
    %c0_67 = arith.constant 0 : index
    %c0_68 = arith.constant 0 : index
    %257 = vector.load %arg14[%256, %c0_67, %c0_68] : memref<8x8x512xf32, #tpu.memory_space<vmem>>, vector<1x8x512xf32>
    %258 = vector.shape_cast %257 : vector<1x8x512xf32> to vector<8x512xf32>
    %259 = arith.truncf %245 : vector<8x128xf32> to vector<8x128xbf16>
    %cst_69 = arith.constant dense<0.000000e+00> : vector<8x512xf32>
    %260 = tpu.matmul %259, %13, %cst_69 {dimension_numbers = #tpu.dot_dimension_numbers<[1], [0], [0], [1], [0, 0, 1, 1], [], []>} : vector<8x128xbf16>, vector<128x512xbf16>, vector<8x512xf32> -> vector<8x512xf32>
    %261 = arith.addf %258, %260 : vector<8x512xf32>
    %262 = vector.extract_strided_slice %261 {offsets = [0, 0], sizes = [8, 128], strides = [1, 1]} : vector<8x512xf32> to vector<8x128xf32>
    %263 = arith.negf %262 : vector<8x128xf32>
    %264 = math.exp %263 : vector<8x128xf32>
    %cst_70 = arith.constant 1.000000e+00 : f32
    %265 = vector.broadcast %cst_70 : f32 to vector<8x128xf32>
    %266 = arith.addf %265, %264 : vector<8x128xf32>
    %267 = arith.divf %265, %266 : vector<8x128xf32>
    %268 = vector.extract_strided_slice %261 {offsets = [0, 128], sizes = [8, 128], strides = [1, 1]} : vector<8x512xf32> to vector<8x128xf32>
    %269 = arith.negf %268 : vector<8x128xf32>
    %270 = math.exp %269 : vector<8x128xf32>
    %cst_71 = arith.constant 1.000000e+00 : f32
    %271 = vector.broadcast %cst_71 : f32 to vector<8x128xf32>
    %272 = arith.addf %271, %270 : vector<8x128xf32>
    %273 = arith.divf %271, %272 : vector<8x128xf32>
    %274 = vector.extract_strided_slice %261 {offsets = [0, 256], sizes = [8, 128], strides = [1, 1]} : vector<8x512xf32> to vector<8x128xf32>
    %275 = math.tanh %274 : vector<8x128xf32>
    %276 = vector.extract_strided_slice %261 {offsets = [0, 384], sizes = [8, 128], strides = [1, 1]} : vector<8x512xf32> to vector<8x128xf32>
    %277 = arith.negf %276 : vector<8x128xf32>
    %278 = math.exp %277 : vector<8x128xf32>
    %cst_72 = arith.constant 1.000000e+00 : f32
    %279 = vector.broadcast %cst_72 : f32 to vector<8x128xf32>
    %280 = arith.addf %279, %278 : vector<8x128xf32>
    %281 = arith.divf %279, %280 : vector<8x128xf32>
    %282 = arith.mulf %273, %249 : vector<8x128xf32>
    %283 = arith.mulf %267, %275 : vector<8x128xf32>
    %284 = arith.addf %282, %283 : vector<8x128xf32>
    %285 = math.tanh %284 : vector<8x128xf32>
    %286 = arith.mulf %281, %285 : vector<8x128xf32>
    %287 = arith.index_cast %c5_i32 : i32 to index
    %c0_73 = arith.constant 0 : index
    %c0_74 = arith.constant 0 : index
    %288 = vector.load %arg3[%287, %c0_73, %c0_74] : memref<8x8x1xf32, #tpu.memory_space<vmem>>, vector<1x8x1xf32>
    %289 = vector.shape_cast %288 : vector<1x8x1xf32> to vector<8x1xf32>
    %290 = arith.subf %286, %245 : vector<8x128xf32>
    %291 = vector.broadcast %289 : vector<8x1xf32> to vector<8x128xf32>
    %292 = arith.mulf %291, %290 : vector<8x128xf32>
    %293 = arith.addf %245, %292 : vector<8x128xf32>
    %294 = arith.subf %284, %249 : vector<8x128xf32>
    %295 = vector.broadcast %289 : vector<8x1xf32> to vector<8x128xf32>
    %296 = arith.mulf %295, %294 : vector<8x128xf32>
    %297 = arith.addf %249, %296 : vector<8x128xf32>
    %298 = vector.broadcast %289 : vector<8x1xf32> to vector<8x128xf32>
    %299 = arith.mulf %298, %286 : vector<8x128xf32>
    %300 = arith.index_cast %c5_i32 : i32 to index
    %c0_75 = arith.constant 0 : index
    %c0_76 = arith.constant 0 : index
    %301 = vector.load %arg9[%300, %c0_75, %c0_76] : memref<8x8x128xf32, #tpu.memory_space<vmem>>, vector<1x8x128xf32>
    %302 = vector.shape_cast %301 : vector<1x8x128xf32> to vector<8x128xf32>
    %303 = vector.shape_cast %299 : vector<8x128xf32> to vector<1x8x128xf32>
    tpu.vector_store %arg9[%300, %c0_75, %c0_76], %303 {strides = array<i32>} : memref<8x8x128xf32, #tpu.memory_space<vmem>>, vector<1x8x128xf32>,
    %c6_i32 = arith.constant 6 : i32
    %304 = arith.index_cast %c6_i32 : i32 to index
    %c0_77 = arith.constant 0 : index
    %c0_78 = arith.constant 0 : index
    %305 = vector.load %arg14[%304, %c0_77, %c0_78] : memref<8x8x512xf32, #tpu.memory_space<vmem>>, vector<1x8x512xf32>
    %306 = vector.shape_cast %305 : vector<1x8x512xf32> to vector<8x512xf32>
    %307 = arith.truncf %293 : vector<8x128xf32> to vector<8x128xbf16>
    %cst_79 = arith.constant dense<0.000000e+00> : vector<8x512xf32>
    %308 = tpu.matmul %307, %13, %cst_79 {dimension_numbers = #tpu.dot_dimension_numbers<[1], [0], [0], [1], [0, 0, 1, 1], [], []>} : vector<8x128xbf16>, vector<128x512xbf16>, vector<8x512xf32> -> vector<8x512xf32>
    %309 = arith.addf %306, %308 : vector<8x512xf32>
    %310 = vector.extract_strided_slice %309 {offsets = [0, 0], sizes = [8, 128], strides = [1, 1]} : vector<8x512xf32> to vector<8x128xf32>
    %311 = arith.negf %310 : vector<8x128xf32>
    %312 = math.exp %311 : vector<8x128xf32>
    %cst_80 = arith.constant 1.000000e+00 : f32
    %313 = vector.broadcast %cst_80 : f32 to vector<8x128xf32>
    %314 = arith.addf %313, %312 : vector<8x128xf32>
    %315 = arith.divf %313, %314 : vector<8x128xf32>
    %316 = vector.extract_strided_slice %309 {offsets = [0, 128], sizes = [8, 128], strides = [1, 1]} : vector<8x512xf32> to vector<8x128xf32>
    %317 = arith.negf %316 : vector<8x128xf32>
    %318 = math.exp %317 : vector<8x128xf32>
    %cst_81 = arith.constant 1.000000e+00 : f32
    %319 = vector.broadcast %cst_81 : f32 to vector<8x128xf32>
    %320 = arith.addf %319, %318 : vector<8x128xf32>
    %321 = arith.divf %319, %320 : vector<8x128xf32>
    %322 = vector.extract_strided_slice %309 {offsets = [0, 256], sizes = [8, 128], strides = [1, 1]} : vector<8x512xf32> to vector<8x128xf32>
    %323 = math.tanh %322 : vector<8x128xf32>
    %324 = vector.extract_strided_slice %309 {offsets = [0, 384], sizes = [8, 128], strides = [1, 1]} : vector<8x512xf32> to vector<8x128xf32>
    %325 = arith.negf %324 : vector<8x128xf32>
    %326 = math.exp %325 : vector<8x128xf32>
    %cst_82 = arith.constant 1.000000e+00 : f32
    %327 = vector.broadcast %cst_82 : f32 to vector<8x128xf32>
    %328 = arith.addf %327, %326 : vector<8x128xf32>
    %329 = arith.divf %327, %328 : vector<8x128xf32>
    %330 = arith.mulf %321, %297 : vector<8x128xf32>
    %331 = arith.mulf %315, %323 : vector<8x128xf32>
    %332 = arith.addf %330, %331 : vector<8x128xf32>
    %333 = math.tanh %332 : vector<8x128xf32>
    %334 = arith.mulf %329, %333 : vector<8x128xf32>
    %335 = arith.index_cast %c6_i32 : i32 to index
    %c0_83 = arith.constant 0 : index
    %c0_84 = arith.constant 0 : index
    %336 = vector.load %arg3[%335, %c0_83, %c0_84] : memref<8x8x1xf32, #tpu.memory_space<vmem>>, vector<1x8x1xf32>
    %337 = vector.shape_cast %336 : vector<1x8x1xf32> to vector<8x1xf32>
    %338 = arith.subf %334, %293 : vector<8x128xf32>
    %339 = vector.broadcast %337 : vector<8x1xf32> to vector<8x128xf32>
    %340 = arith.mulf %339, %338 : vector<8x128xf32>
    %341 = arith.addf %293, %340 : vector<8x128xf32>
    %342 = arith.subf %332, %297 : vector<8x128xf32>
    %343 = vector.broadcast %337 : vector<8x1xf32> to vector<8x128xf32>
    %344 = arith.mulf %343, %342 : vector<8x128xf32>
    %345 = arith.addf %297, %344 : vector<8x128xf32>
    %346 = vector.broadcast %337 : vector<8x1xf32> to vector<8x128xf32>
    %347 = arith.mulf %346, %334 : vector<8x128xf32>
    %348 = arith.index_cast %c6_i32 : i32 to index
    %c0_85 = arith.constant 0 : index
    %c0_86 = arith.constant 0 : index
    %349 = vector.load %arg9[%348, %c0_85, %c0_86] : memref<8x8x128xf32, #tpu.memory_space<vmem>>, vector<1x8x128xf32>
    %350 = vector.shape_cast %349 : vector<1x8x128xf32> to vector<8x128xf32>
    %351 = vector.shape_cast %347 : vector<8x128xf32> to vector<1x8x128xf32>
    tpu.vector_store %arg9[%348, %c0_85, %c0_86], %351 {strides = array<i32>} : memref<8x8x128xf32, #tpu.memory_space<vmem>>, vector<1x8x128xf32>,
    %c7_i32 = arith.constant 7 : i32
    %352 = arith.index_cast %c7_i32 : i32 to index
    %c0_87 = arith.constant 0 : index
    %c0_88 = arith.constant 0 : index
    %353 = vector.load %arg14[%352, %c0_87, %c0_88] : memref<8x8x512xf32, #tpu.memory_space<vmem>>, vector<1x8x512xf32>
    %354 = vector.shape_cast %353 : vector<1x8x512xf32> to vector<8x512xf32>
    %355 = arith.truncf %341 : vector<8x128xf32> to vector<8x128xbf16>
    %cst_89 = arith.constant dense<0.000000e+00> : vector<8x512xf32>
    %356 = tpu.matmul %355, %13, %cst_89 {dimension_numbers = #tpu.dot_dimension_numbers<[1], [0], [0], [1], [0, 0, 1, 1], [], []>} : vector<8x128xbf16>, vector<128x512xbf16>, vector<8x512xf32> -> vector<8x512xf32>
    %357 = arith.addf %354, %356 : vector<8x512xf32>
    %358 = vector.extract_strided_slice %357 {offsets = [0, 0], sizes = [8, 128], strides = [1, 1]} : vector<8x512xf32> to vector<8x128xf32>
    %359 = arith.negf %358 : vector<8x128xf32>
    %360 = math.exp %359 : vector<8x128xf32>
    %cst_90 = arith.constant 1.000000e+00 : f32
    %361 = vector.broadcast %cst_90 : f32 to vector<8x128xf32>
    %362 = arith.addf %361, %360 : vector<8x128xf32>
    %363 = arith.divf %361, %362 : vector<8x128xf32>
    %364 = vector.extract_strided_slice %357 {offsets = [0, 128], sizes = [8, 128], strides = [1, 1]} : vector<8x512xf32> to vector<8x128xf32>
    %365 = arith.negf %364 : vector<8x128xf32>
    %366 = math.exp %365 : vector<8x128xf32>
    %cst_91 = arith.constant 1.000000e+00 : f32
    %367 = vector.broadcast %cst_91 : f32 to vector<8x128xf32>
    %368 = arith.addf %367, %366 : vector<8x128xf32>
    %369 = arith.divf %367, %368 : vector<8x128xf32>
    %370 = vector.extract_strided_slice %357 {offsets = [0, 256], sizes = [8, 128], strides = [1, 1]} : vector<8x512xf32> to vector<8x128xf32>
    %371 = math.tanh %370 : vector<8x128xf32>
    %372 = vector.extract_strided_slice %357 {offsets = [0, 384], sizes = [8, 128], strides = [1, 1]} : vector<8x512xf32> to vector<8x128xf32>
    %373 = arith.negf %372 : vector<8x128xf32>
    %374 = math.exp %373 : vector<8x128xf32>
    %cst_92 = arith.constant 1.000000e+00 : f32
    %375 = vector.broadcast %cst_92 : f32 to vector<8x128xf32>
    %376 = arith.addf %375, %374 : vector<8x128xf32>
    %377 = arith.divf %375, %376 : vector<8x128xf32>
    %378 = arith.mulf %369, %345 : vector<8x128xf32>
    %379 = arith.mulf %363, %371 : vector<8x128xf32>
    %380 = arith.addf %378, %379 : vector<8x128xf32>
    %381 = math.tanh %380 : vector<8x128xf32>
    %382 = arith.mulf %377, %381 : vector<8x128xf32>
    %383 = arith.index_cast %c7_i32 : i32 to index
    %c0_93 = arith.constant 0 : index
    %c0_94 = arith.constant 0 : index
    %384 = vector.load %arg3[%383, %c0_93, %c0_94] : memref<8x8x1xf32, #tpu.memory_space<vmem>>, vector<1x8x1xf32>
    %385 = vector.shape_cast %384 : vector<1x8x1xf32> to vector<8x1xf32>
    %386 = arith.subf %382, %341 : vector<8x128xf32>
    %387 = vector.broadcast %385 : vector<8x1xf32> to vector<8x128xf32>
    %388 = arith.mulf %387, %386 : vector<8x128xf32>
    %389 = arith.addf %341, %388 : vector<8x128xf32>
    %390 = arith.subf %380, %345 : vector<8x128xf32>
    %391 = vector.broadcast %385 : vector<8x1xf32> to vector<8x128xf32>
    %392 = arith.mulf %391, %390 : vector<8x128xf32>
    %393 = arith.addf %345, %392 : vector<8x128xf32>
    %394 = vector.broadcast %385 : vector<8x1xf32> to vector<8x128xf32>
    %395 = arith.mulf %394, %382 : vector<8x128xf32>
    %396 = arith.index_cast %c7_i32 : i32 to index
    %c0_95 = arith.constant 0 : index
    %c0_96 = arith.constant 0 : index
    %397 = vector.load %arg9[%396, %c0_95, %c0_96] : memref<8x8x128xf32, #tpu.memory_space<vmem>>, vector<1x8x128xf32>
    %398 = vector.shape_cast %397 : vector<1x8x128xf32> to vector<8x128xf32>
    %399 = vector.shape_cast %395 : vector<8x128xf32> to vector<1x8x128xf32>
    tpu.vector_store %arg9[%396, %c0_95, %c0_96], %399 {strides = array<i32>} : memref<8x8x128xf32, #tpu.memory_space<vmem>>, vector<1x8x128xf32>,
    %c8_i32 = arith.constant 8 : i32
    %c0_97 = arith.constant 0 : index
    %c0_98 = arith.constant 0 : index
    %400 = vector.load %arg12[%c0_97, %c0_98] : memref<8x128xf32, #tpu.memory_space<vmem>>, vector<8x128xf32>
    tpu.vector_store %arg12[%c0_97, %c0_98], %389 {strides = array<i32>} : memref<8x128xf32, #tpu.memory_space<vmem>>, vector<8x128xf32>,
    %c0_99 = arith.constant 0 : index
    %c0_100 = arith.constant 0 : index
    %401 = vector.load %arg13[%c0_99, %c0_100] : memref<8x128xf32, #tpu.memory_space<vmem>>, vector<8x128xf32>
    tpu.vector_store %arg13[%c0_99, %c0_100], %393 {strides = array<i32>} : memref<8x128xf32, #tpu.memory_space<vmem>>, vector<8x128xf32>,
    %c0_i32_101 = arith.constant 0 : i32
    %402 = arith.cmpi eq, %arg1, %c0_i32_101 : i32
    %403 = arith.extui %402 : i1 to i32
    %c0_i32_102 = arith.constant 0 : i32
    %404 = arith.cmpi ne, %403, %c0_i32_102 : i32
    scf.if %404 {
      %c0_103 = arith.constant 0 : index
      %c0_104 = arith.constant 0 : index
      %405 = vector.load %arg10[%c0_103, %c0_104] : memref<8x128xf32, #tpu.memory_space<vmem>>, vector<8x128xf32>
      tpu.vector_store %arg10[%c0_103, %c0_104], %389 {strides = array<i32>} : memref<8x128xf32, #tpu.memory_space<vmem>>, vector<8x128xf32>,
      %c0_105 = arith.constant 0 : index
      %c0_106 = arith.constant 0 : index
      %406 = vector.load %arg11[%c0_105, %c0_106] : memref<8x128xf32, #tpu.memory_space<vmem>>, vector<8x128xf32>
      tpu.vector_store %arg11[%c0_105, %c0_106], %393 {strides = array<i32>} : memref<8x128xf32, #tpu.memory_space<vmem>>, vector<8x128xf32>,
    } else {
    }
    return
  }
  func.func @transform_0(%arg0: i32, %arg1: i32) -> (i32, i32, i32) {
    %c0_i32 = arith.constant 0 : i32
    %c0_i32_0 = arith.constant 0 : i32
    return %arg1, %arg0, %c0_i32 : i32, i32, i32
  }
  func.func @transform_1(%arg0: i32, %arg1: i32) -> (i32, i32, i32) {
    %c0_i32 = arith.constant 0 : i32
    %c0_i32_0 = arith.constant 0 : i32
    return %arg1, %arg0, %c0_i32 : i32, i32, i32
  }
  func.func @transform_2(%arg0: i32, %arg1: i32) -> (i32, i32) {
    %c0_i32 = arith.constant 0 : i32
    %c0_i32_0 = arith.constant 0 : i32
    return %arg0, %c0_i32 : i32, i32
  }
  func.func @transform_3(%arg0: i32, %arg1: i32) -> (i32, i32) {
    %c0_i32 = arith.constant 0 : i32
    %c0_i32_0 = arith.constant 0 : i32
    return %arg0, %c0_i32 : i32, i32
  }
  func.func @transform_4(%arg0: i32, %arg1: i32) -> (i32, i32) {
    %c0_i32 = arith.constant 0 : i32
    %c0_i32_0 = arith.constant 0 : i32
    %c0_i32_1 = arith.constant 0 : i32
    return %c0_i32, %c0_i32_0 : i32, i32
  }
  func.func @transform_5(%arg0: i32, %arg1: i32) -> (i32, i32) {
    %c0_i32 = arith.constant 0 : i32
    %c0_i32_0 = arith.constant 0 : i32
    %c0_i32_1 = arith.constant 0 : i32
    return %c0_i32, %c0_i32_0 : i32, i32
  }
  func.func @transform_6(%arg0: i32, %arg1: i32) -> (i32, i32) {
    %c0_i32 = arith.constant 0 : i32
    %c0_i32_0 = arith.constant 0 : i32
    %c0_i32_1 = arith.constant 0 : i32
    return %c0_i32, %c0_i32_0 : i32, i32
  }
  func.func @transform_7(%arg0: i32, %arg1: i32) -> (i32, i32, i32) {
    %c0_i32 = arith.constant 0 : i32
    %c0_i32_0 = arith.constant 0 : i32
    return %arg1, %arg0, %c0_i32 : i32, i32, i32
  }
  func.func @transform_8(%arg0: i32, %arg1: i32) -> (i32, i32) {
    %c0_i32 = arith.constant 0 : i32
    %c0_i32_0 = arith.constant 0 : i32
    return %arg0, %c0_i32 : i32, i32
  }
  func.func @transform_9(%arg0: i32, %arg1: i32) -> (i32, i32) {
    %c0_i32 = arith.constant 0 : i32
    %c0_i32_0 = arith.constant 0 : i32
    return %arg0, %c0_i32 : i32, i32
  }
}

</mosaic_0001>

<bundles_post_ra>
// kernel: tpu_custom_call.1
= control target key start
LH: loop header
LB: loop body
LE: loop exit
PB: predicated region body
PF: predicated region fallthrough
CT: control target
= control target key end

     0   :  { %15 = vsyncpa [#allocation6], 0  ;;  %s2802_s0 = inlined_call_operand.vmem [shape: f32[8,8,16], index: 0, kind: input, shape index: {}]   ;;  %s2803_s1 = inlined_call_operand.vmem [shape: f32[8,8,1], index: 1, kind: input, shape index: {}]   ;;  %s2804_s2 = inlined_call_operand.vmem [shape: f32[8,128], index: 2, kind: input, shape index: {}]   ;;  %s2805_s3 = inlined_call_operand.hbm [shape: f32[8,128], index: 3, kind: input, shape index: {}]   ;;  %s2806_s4 = inlined_call_operand.hbm [shape: bf16[16,512], index: 4, kind: input, shape index: {}]   ;;  %s2807_s5 = inlined_call_operand.hbm [shape: bf16[128,512], index: 5, kind: input, shape index: {}]   ;;  %s2808_s6 = inlined_call_operand.vmem [shape: f32[1,512], index: 6, kind: input, shape index: {}]   ;;  %s2809_s7 = inlined_call_operand.hbm [shape: f32[8,8,128], index: 7, kind: output, shape index: {0}]   ;;  %s2810_s8 = inlined_call_operand.hbm [shape: f32[8,128], index: 8, kind: output, shape index: {1}]   ;;  %s2811_s9 = inlined_call_operand.hbm [shape: f32[8,128], index: 9, kind: output, shape index: {2}]  }
   0x1   :  { %16 = vsyncpa [#allocation9], 0 }
   0x2   :  { %17 = vsyncpa [#allocation7], 0 }
   0x3   :  { %18 = vsyncpa [#allocation13], 0  ;;  %s2057_s30 = smov [#allocation8]  }
   0x4   :  { %s40_s10 = sshll.u32 %s2057_s30, 4  ;;  %s41_s10 = int_to_ptr.vmem [resolvable:$true] %s40_s10 }
   0x5   :  { %s1937_s11 = scalar_lea.vmem %s41_s10, 512  ;;  %p1942_p1 = scmp.lt.s32.totalorder %s41_s10, %s41_s10 }
   0x6   :  { %p1938_p0 = scmp.ne.s32.totalorder %s41_s10, %s1937_s11  ;;  %p1943_p2 = scmp.lt.s32.totalorder %s1937_s11, %s1937_s11 }
   0x8   :  { %p1944_p3 = por %p1943_p2, %p1942_p1 }
   0xa   :  { %p1945_p4 = pnand %p1944_p3, %p1938_p0 }
   0xc   :  { %1948 = shalt.err (!%p1945_p4)
}
   0xd   :  { %s2058_s12 = smov 256   ;;  %s2059_s13 = smov 16  }
   0xe   :  { %46 = dma.hbm_to_vmem [thread:$0]  %s2806_s4, 512, %s41_s10, [#allocation9], %s2058_s12, %s2058_s12, %s2059_s13  }
   0xf   :  { %s2060_s16 = smov [#allocation5]   ;;  %s2061_s18 = smov [#allocation10]  }
  0x10   :  { %s31_s17 = sshll.u32 %s2060_s16, 4  ;;  %s52_s19 = sshll.u32 %s2061_s18, 4  ;;  %s32_s17 = int_to_ptr.vmem [resolvable:$true] %s31_s17  ;;  %s53_s19 = int_to_ptr.vmem [resolvable:$true] %s52_s19 }
  0x11   :  { %s1957_s20 = scalar_lea.vmem %s32_s17, 128  ;;  %p1962_p6 = scmp.lt.s32.totalorder %s32_s17, %s32_s17 }
  0x12   :  { %p1958_p5 = scmp.ne.s32.totalorder %s32_s17, %s1957_s20  ;;  %p1963_p7 = scmp.lt.s32.totalorder %s1957_s20, %s1957_s20 }
  0x14   :  { %p1964_p8 = por %p1963_p7, %p1962_p6 }
  0x16   :  { %p1965_p9 = pnand %p1964_p8, %p1958_p5 }
  0x18   :  { %1968 = shalt.err (!%p1965_p9)
}
  0x19   :  { %34 = dma.hbm_to_vmem [thread:$0]  %s2805_s3, 128, %s32_s17, [#allocation6]  }
  0x1a   :  { %s1977_s23 = scalar_lea.vmem %s53_s19, 4096  ;;  %p1982_p11 = scmp.lt.s32.totalorder %s53_s19, %s53_s19 }
  0x1b   :  { %p1978_p10 = scmp.ne.s32.totalorder %s53_s19, %s1977_s23  ;;  %p1983_p12 = scmp.lt.s32.totalorder %s1977_s23, %s1977_s23 }
  0x1d   :  { %p1984_p13 = por %p1983_p12, %p1982_p11 }
  0x1f   :  { %p1985_p0 = pnand %p1984_p13, %p1978_p10 }
  0x21   :  { %1988 = shalt.err (!%p1985_p0)
}
  0x22   :  { %58 = dma.hbm_to_vmem [thread:$0]  %s2807_s5, 4096, %s53_s19, [#allocation9], %s2058_s12, %s2058_s12, %s2059_s13  }
  0x23   :  { %2049 = dma.done.wait [#allocation6], 128  }
  0x24   :  { %2050 = vsyncadd [#allocation6], 4294967168 }
  0x25   :  { %2051 = dma.done.wait [#allocation9], 4608  }
  0x26   :  { %2052 = vsyncadd [#allocation9], 4294962688  ;;  %v2812_v0 = vmov 0   ;;  %v1715_v1 = vld [vmem:[#allocation8 + $0x4] ss:$16 sps:$4 sm:$0xff]   ;;  %v79_v5 = vld [vmem:[%s2802_s0] sm:$0xff]  ;;  %v97_v55 = vlaneseq }
  0x27   :  { %182 = vmatprep.mubr.bf16.mxu0 %v2812_v0  ;;  %255 = vmatprep.mubr.bf16.mxu1 %v2812_v0  ;;  %v1717_v2 = vld [vmem:[#allocation8 + $0xc] ss:$16 sps:$4 sm:$0xff]   ;;  %v1719_v3 = vld [vmem:[#allocation8] ss:$16 sps:$4 sm:$0xff]   ;;  %v1720_v4 = vld [vmem:[#allocation8 + $0x8] ss:$16 sps:$4 sm:$0xff]  }
  0x28   :  { %1713 = vset.pattern.permute.xlu0 %v2812_v0  ;;  %1714 = vset.pattern.permute.xlu1 %v2812_v0  ;;  %v80_v6 = vld [vmem:[%s2802_s0 + $0x8] sm:$0xff]  ;;  %vm137_vm0 = vcmask 130048   ;;  %v2139_v9 = vld [vmem:[#allocation10 + $0xec] ss:$16 sps:$4 sm:$0xff]   ;;  %v2143_v11 = vld [vmem:[#allocation10 + $0xe8] ss:$16 sps:$4 sm:$0xff]  }
  0x29   :  { %164 = vmatprep.subr.bf16.mxu0 %v1715_v1  ;;  %237 = vmatprep.subr.bf16.mxu1 %v1717_v2  ;;  %v87_v7 = vpack.c.bf16 %v80_v6, %v79_v5  ;;  %v2137_v8 = vld [vmem:[#allocation10 + $0xe4] ss:$16 sps:$4 sm:$0xff]   ;;  %v2141_v10 = vld [vmem:[#allocation10 + $0xe0] ss:$16 sps:$4 sm:$0xff]   ;;  %v2150_v13 = vld [vmem:[#allocation10 + $0xcc] ss:$16 sps:$4 sm:$0xff]  }
  0x2a   :  { %165 = vmatpush1.bf16.msra.mxu0 %v1719_v3  ;;  %238 = vmatpush1.bf16.msra.mxu1 %v1720_v4  ;;  %v2146_v12 = vld [vmem:[#allocation10 + $0xc4] ss:$16 sps:$4 sm:$0xff]   ;;  %v2154_v14 = vld [vmem:[#allocation10 + $0xc0] ss:$16 sps:$4 sm:$0xff]   ;;  %v2156_v15 = vld [vmem:[#allocation10 + $0xc8] ss:$16 sps:$4 sm:$0xff]  }
  0x2b   :  { %527 = vmatprep.subr.bf16.mxu0 %v2137_v8  ;;  %568 = vmatprep.subr.bf16.mxu1 %v2139_v9  ;;  %v81_v16 = vld [vmem:[%s2802_s0 + $0x10] sm:$0xff]  ;;  %v82_v17 = vld [vmem:[%s2802_s0 + $0x18] sm:$0xff]  ;;  %v83_v26 = vld [vmem:[%s2802_s0 + $0x20] sm:$0xff]  ;;  %v98_v56 = vshrl.u32 %v97_v55, 7  ;;  %s2064_s12 = smov [#allocation12]   ;;  %s2065_s14 = smov [#allocation14]  }
  0x2c   :  { %v2168_v18 = vld [vmem:[#allocation10 + $0xa4] ss:$16 sps:$4 sm:$0xff]   ;;  %v88_v19 = vpack.c.bf16 %v82_v17, %v81_v16  ;;  %v2171_v20 = vld [vmem:[#allocation10 + $0xac] ss:$16 sps:$4 sm:$0xff]   ;;  %v2173_v21 = vld [vmem:[#allocation10 + $0xa0] ss:$16 sps:$4 sm:$0xff]  }
  0x2d   :  { %1631 = vmatmul.mubr.msk.bf16.vlgmr.msra.gmra.mxu0 %vm137_vm0, %v87_v7  ;;  %1635 = vmatmul.mubr.msk.bf16.vlgmr.msra.gmra.mxu1 %vm137_vm0, %v87_v7  ;;  %v2176_v22 = vld [vmem:[#allocation10 + $0xa8] ss:$16 sps:$4 sm:$0xff]   ;;  %v2180_v23 = vld [vmem:[#allocation10 + $0x84] ss:$16 sps:$4 sm:$0xff]   ;;  %v2183_v24 = vld [vmem:[#allocation10 + $0x8c] ss:$16 sps:$4 sm:$0xff]  }
  0x2e   :  { %528 = vmatpush1.bf16.msra.mxu0 %v2141_v10  ;;  %569 = vmatpush1.bf16.msra.mxu1 %v2143_v11  ;;  %v2185_v25 = vld [vmem:[#allocation10 + $0x80] ss:$16 sps:$4 sm:$0xff]   ;;  %v2199_v28 = vld [vmem:[#allocation10 + $0x88] ss:$16 sps:$4 sm:$0xff]   ;;  %v2201_v29 = vld [vmem:[#allocation10 + $0x64] ss:$16 sps:$4 sm:$0xff]  }
  0x2f   :  { %529 = vmatprep.subr.bf16.mxu0 %v2146_v12  ;;  %570 = vmatprep.subr.bf16.mxu1 %v2150_v13  ;;  %v84_v27 = vld [vmem:[%s2802_s0 + $0x28] sm:$0xff]  ;;  %v2205_v30 = vld [vmem:[#allocation10 + $0x6c] ss:$16 sps:$4 sm:$0xff]   ;;  %v2210_v33 = vld [vmem:[#allocation10 + $0x68] ss:$16 sps:$4 sm:$0xff]   ;;  %v107_v57 = vsub.s32 2, %v98_v56 }
  0x30   :  { %192 = vmatprep.mubr.bf16.mxu0 %v2812_v0  ;;  %265 = vmatprep.mubr.bf16.mxu1 %v2812_v0  ;;  %v89_v31 = vpack.c.bf16 %v84_v27, %v83_v26  ;;  %v2208_v32 = vld [vmem:[#allocation10 + $0x60] ss:$16 sps:$4 sm:$0xff]   ;;  %v2214_v34 = vld [vmem:[#allocation10 + $0x44] ss:$16 sps:$4 sm:$0xff]   ;;  %v2217_v35 = vld [vmem:[#allocation10 + $0x4c] ss:$16 sps:$4 sm:$0xff]  }
  0x31   :  { %v2221_v36 = vld [vmem:[#allocation10 + $0x40] ss:$16 sps:$4 sm:$0xff]   ;;  %v2223_v37 = vld [vmem:[#allocation10 + $0x48] ss:$16 sps:$4 sm:$0xff]   ;;  %v2235_v40 = vld [vmem:[#allocation10 + $0x24] ss:$16 sps:$4 sm:$0xff]  }
  0x32   :  { %530 = vmatpush1.bf16.msra.mxu0 %v2154_v14  ;;  %571 = vmatpush1.bf16.msra.mxu1 %v2156_v15  ;;  %v85_v38 = vld [vmem:[%s2802_s0 + $0x30] sm:$0xff]  ;;  %v86_v39 = vld [vmem:[%s2802_s0 + $0x38] sm:$0xff]  ;;  %v637_v43 = vld [vmem:[%s2803_s1] sm:$0xff]  ;;  %v99_v58 = vsub.s32 0, %v98_v56  ;;  %v111_v59 = vsub.s32 3, %v98_v56  ;;  %v103_v1 = vsub.s32 1, %v98_v56 }
  0x33   :  { %531 = vmatprep.subr.bf16.mxu0 %v2168_v18  ;;  %572 = vmatprep.subr.bf16.mxu1 %v2171_v20  ;;  %v2239_v41 = vld [vmem:[#allocation10 + $0x2c] ss:$16 sps:$4 sm:$0xff]   ;;  %v90_v42 = vpack.c.bf16 %v86_v39, %v85_v38  ;;  %v2245_v44 = vld [vmem:[#allocation10 + $0x20] ss:$16 sps:$4 sm:$0xff]   ;;  %v2249_v45 = vld [vmem:[#allocation10 + $0x28] ss:$16 sps:$4 sm:$0xff]  }
  0x34   :  { %641 = vperm.xlu0 %1713, %v637_v43   ;;  %v2251_v46 = vld [vmem:[#allocation10 + $0x4] ss:$16 sps:$4 sm:$0xff]   ;;  %v2254_v47 = vld [vmem:[#allocation10 + $0xc] ss:$16 sps:$4 sm:$0xff]   ;;  %v2259_v48 = vld [vmem:[#allocation10] ss:$16 sps:$4 sm:$0xff]  }
  0x35   :  { %1632 = vmatmul.mubr.msk.bf16.gmra.mxu0 %vm137_vm0, %v88_v19  ;;  %1636 = vmatmul.mubr.msk.bf16.gmra.mxu1 %vm137_vm0, %v88_v19  ;;  %v2265_v49 = vld [vmem:[%s2804_s2] sm:$0xff]  ;;  %v1677_v50 = vld [vmem:[%s2803_s1 + $0x8] sm:$0xff]  ;;  %v1697_v54 = vld [vmem:[%s2803_s1 + $0x30] sm:$0xff]  ;;  %s1600_s13 = sshll.u32 %s2064_s12, 4  ;;  %s1610_s15 = sshll.u32 %s2065_s14, 4  ;;  %s1601_s13 = int_to_ptr.vmem [resolvable:$true] %s1600_s13  ;;  %s1611_s15 = int_to_ptr.vmem [resolvable:$true] %s1610_s15 }
  0x36   :  { %532 = vmatpush1.bf16.msra.mxu0 %v2173_v21  ;;  %202 = vmatprep.mubr.bf16.mxu0 %v2812_v0  ;;  %v2272_v51 = vld [vmem:[#allocation10 + $0x8] ss:$16 sps:$4 sm:$0xff]   ;;  %v366_v52 = vpack.c.bf16 %v2265_v49, %v2265_v49 }
  0x37   :  { %573 = vmatpush1.bf16.msra.mxu1 %v2176_v22  ;;  %533 = vmatprep.subr.bf16.mxu0 %v2180_v23  ;;  %v1689_v53 = vld [vmem:[%s2803_s1 + $0x20] sm:$0xff] }
  0x38   :  { %574 = vmatprep.subr.bf16.mxu1 %v2183_v24  ;;  %275 = vmatprep.mubr.bf16.mxu1 %v2812_v0  ;;  %v95_v60 = vld [vmem:[%s2808_s6] sm:$0xf] }
  0x39   :  { %772 = vperm.xlu0 %1713, %v1677_v50   ;;  %v2329_v63 = vrot.slane %v95_v60, %v107_v57  ;;  %v100_v4 = vrot.slane %v95_v60, %v99_v58  ;;  %v2335_v5 = vrot.slane %v95_v60, %v111_v59  ;;  %v104_v16 = vrot.slane %v95_v60, %v103_v1 }
  0x3a   :  { %534 = vmatpush1.bf16.msra.mxu0 %v2185_v25 }
  0x3b   :  { %575 = vmatpush1.bf16.msra.mxu1 %v2199_v28  ;;  %535 = vmatprep.subr.bf16.mxu0 %v2201_v29 }
  0x3c   :  { %576 = vmatprep.subr.bf16.mxu1 %v2205_v30 }
  0x3d   :  { %1633 = vmatmul.mubr.msk.bf16.gmra.mxu0 %vm137_vm0, %v89_v31  ;;  %1637 = vmatmul.mubr.msk.bf16.gmra.mxu1 %vm137_vm0, %v89_v31 }
  0x3e   :  { %536 = vmatpush1.bf16.msra.mxu0 %v2208_v32  ;;  %212 = vmatprep.mubr.bf16.mxu0 %v2812_v0 }
  0x3f   :  { %577 = vmatpush1.bf16.msra.mxu1 %v2210_v33  ;;  %537 = vmatprep.subr.bf16.mxu0 %v2214_v34 }
  0x40   :  { %578 = vmatprep.subr.bf16.mxu1 %v2217_v35  ;;  %285 = vmatprep.mubr.bf16.mxu1 %v2812_v0 }
  0x41   :  { %1168 = vperm.xlu0 %1713, %v1689_v53  }
  0x42   :  { %538 = vmatpush1.bf16.msra.mxu0 %v2221_v36 }
  0x43   :  { %579 = vmatpush1.bf16.msra.mxu1 %v2223_v37  ;;  %539 = vmatprep.subr.bf16.mxu0 %v2235_v40 }
  0x44   :  { %580 = vmatprep.subr.bf16.mxu1 %v2239_v41 }
  0x45   :  { %1634 = vmatmul.mubr.msk.bf16.gmra.mxu0 %vm137_vm0, %v90_v42  ;;  %1638 = vmatmul.mubr.msk.bf16.gmra.mxu1 %vm137_vm0, %v90_v42 }
  0x46   :  { %540 = vmatpush1.bf16.msra.mxu0 %v2245_v44  ;;  %559 = vmatprep.mubr.bf16.mxu0 %v2812_v0 }
  0x47   :  { %581 = vmatpush1.bf16.msra.mxu1 %v2249_v45  ;;  %541 = vmatprep.subr.bf16.mxu0 %v2251_v46 }
  0x48   :  { %582 = vmatprep.subr.bf16.mxu1 %v2254_v47  ;;  %600 = vmatprep.mubr.bf16.mxu1 %v2812_v0 }
  0x49   :  { %1432 = vperm.xlu0 %1713, %v1697_v54  }
  0x4a   :  { %542 = vmatpush1.bf16.msra.mxu0 %v2259_v48 }
  0x4b   :  { %583 = vmatpush1.bf16.msra.mxu1 %v2272_v51  ;;  %657 = vmatprep.subr.bf16.mxu0 %v2137_v8 }
  0x4c   :  { %698 = vmatprep.subr.bf16.mxu1 %v2139_v9 }
  0x4d   :  { %560 = vmatmul.mubr.bf16.vlgmr.msra.gmra.mxu0 %v366_v52 }
  0x4e   :  { %601 = vmatmul.mubr.bf16.vlgmr.msra.gmra.mxu1 %v366_v52  ;;  %658 = vmatpush1.bf16.msra.mxu0 %v2141_v10 }
  0x4f   :  { %699 = vmatpush1.bf16.msra.mxu1 %v2143_v11  ;;  %659 = vmatprep.subr.bf16.mxu0 %v2146_v12 }
  0x50   :  { %700 = vmatprep.subr.bf16.mxu1 %v2150_v13  ;;  %689 = vmatprep.mubr.bf16.mxu0 %v2812_v0 }
  0x51   :  { %730 = vmatprep.mubr.bf16.mxu1 %v2812_v0 }
  0x52   :  { %660 = vmatpush1.bf16.msra.mxu0 %v2154_v14 }
  0x53   :  { %701 = vmatpush1.bf16.msra.mxu1 %v2156_v15  ;;  %661 = vmatprep.subr.bf16.mxu0 %v2168_v18 }
  0x54   :  { %702 = vmatprep.subr.bf16.mxu1 %v2171_v20 }
  0x56   :  { %662 = vmatpush1.bf16.msra.mxu0 %v2173_v21 }
  0x57   :  { %703 = vmatpush1.bf16.msra.mxu1 %v2176_v22  ;;  %663 = vmatprep.subr.bf16.mxu0 %v2180_v23 }
  0x58   :  { %704 = vmatprep.subr.bf16.mxu1 %v2183_v24 }
  0x5a   :  { %664 = vmatpush1.bf16.msra.mxu0 %v2185_v25 }
  0x5b   :  { %705 = vmatpush1.bf16.msra.mxu1 %v2199_v28  ;;  %665 = vmatprep.subr.bf16.mxu0 %v2201_v29 }
  0x5c   :  { %706 = vmatprep.subr.bf16.mxu1 %v2205_v30 }
  0x5e   :  { %666 = vmatpush1.bf16.msra.mxu0 %v2208_v32 }
  0x5f   :  { %707 = vmatpush1.bf16.msra.mxu1 %v2210_v33  ;;  %667 = vmatprep.subr.bf16.mxu0 %v2214_v34 }
  0x60   :  { %708 = vmatprep.subr.bf16.mxu1 %v2217_v35 }
  0x62   :  { %668 = vmatpush1.bf16.msra.mxu0 %v2221_v36 }
  0x63   :  { %709 = vmatpush1.bf16.msra.mxu1 %v2223_v37  ;;  %669 = vmatprep.subr.bf16.mxu0 %v2235_v40 }
  0x64   :  { %710 = vmatprep.subr.bf16.mxu1 %v2239_v41 }
  0x66   :  { %670 = vmatpush1.bf16.msra.mxu0 %v2245_v44 }
  0x67   :  { %711 = vmatpush1.bf16.msra.mxu1 %v2249_v45  ;;  %671 = vmatprep.subr.bf16.mxu0 %v2251_v46 }
  0x68   :  { %712 = vmatprep.subr.bf16.mxu1 %v2254_v47 }
  0x6a   :  { %672 = vmatpush1.bf16.msra.mxu0 %v2259_v48 }
  0x6b   :  { %713 = vmatpush1.bf16.msra.mxu1 %v2272_v51  ;;  %789 = vmatprep.subr.bf16.mxu0 %v2137_v8 }
  0x6c   :  { %830 = vmatprep.subr.bf16.mxu1 %v2139_v9 }
  0xed   :  { %v2325_v61 = vpop.f32.mrf.mxu0  ;;  %v2327_v62 = vpop.f32.mrf.mxu1 }
  0xef   :  { %v2331_v2 = vpop.f32.mrf.mxu0  ;;  %v2333_v3 = vpop.f32.mrf.mxu1 }
  0xf1   :  { %v188_v6 = vpop.f32.mrf.mxu0  ;;  %v261_v7 = vpop.f32.mrf.mxu1 }
  0xf2   :  { %v2337_v17 = vadd.f32 %v188_v6, %v100_v4  ;;  %v2340_v19 = vadd.f32 %v261_v7, %v2329_v63 }
  0xf3   :  { %v190_v26 = vpop.f32.mrf.mxu0  ;;  %v263_v27 = vpop.f32.mrf.mxu1 }
  0xf4   :  { %v2342_v31 = vadd.f32 %v190_v26, %v104_v16  ;;  %v2345_v38 = vadd.f32 %v263_v27, %v2335_v5 }
  0xf5   :  { %v194_v39 = vpop.f32.mrf.mxu0  ;;  %v267_v42 = vpop.f32.mrf.mxu1 }
  0xf6   :  { %v2347_v43 = vadd.f32 %v194_v39, %v100_v4  ;;  %v2350_v50 = vadd.f32 %v267_v42, %v2329_v63 }
  0xf7   :  { %v196_v52 = vpop.f32.mrf.mxu0  ;;  %v269_v53 = vpop.f32.mrf.mxu1 }
  0xf8   :  { %2814 = vst [vmem:[#allocation19_spill] sm:$0xff] %v2350_v50  ;;  %v2352_v54 = vadd.f32 %v196_v52, %v104_v16  ;;  %v2355_v55 = vadd.f32 %v269_v53, %v2335_v5 }
  0xf9   :  { %v198_v56 = vpop.f32.mrf.mxu0  ;;  %v271_v57 = vpop.f32.mrf.mxu1 }
  0xfa   :  { %2815 = vst [vmem:[#allocation20_spill] sm:$0xff] %v2355_v55  ;;  %v2357_v58 = vadd.f32 %v198_v56, %v100_v4  ;;  %v2360_v59 = vadd.f32 %v271_v57, %v2329_v63 }
  0xfb   :  { %v200_v60 = vpop.f32.mrf.mxu0  ;;  %v273_v1 = vpop.f32.mrf.mxu1 }
  0xfc   :  { %2816 = vst [vmem:[#allocation21_spill] sm:$0xff] %v2357_v58  ;;  %2817 = vst [vmem:[#allocation22_spill] sm:$0xff] %v2360_v59  ;;  %v2362_v6 = vadd.f32 %v200_v60, %v104_v16  ;;  %v2365_v7 = vadd.f32 %v273_v1, %v2335_v5 }
  0xfd   :  { %v204_v26 = vpop.f32.mrf.mxu0  ;;  %v277_v27 = vpop.f32.mrf.mxu1 }
  0xfe   :  { %2818 = vst [vmem:[#allocation23_spill] sm:$0xff] %v2362_v6  ;;  %2819 = vst [vmem:[#allocation24_spill] sm:$0xff] %v2365_v7  ;;  %v2367_v39 = vadd.f32 %v204_v26, %v100_v4  ;;  %v2370_v42 = vadd.f32 %v277_v27, %v2329_v63 }
  0xff   :  { %v206_v52 = vpop.f32.mrf.mxu0  ;;  %v279_v53 = vpop.f32.mrf.mxu1 }
 0x100   :  { %2820 = vst [vmem:[#allocation25_spill] sm:$0xff] %v2367_v39  ;;  %2821 = vst [vmem:[#allocation26_spill] sm:$0xff] %v2370_v42  ;;  %v2372_v56 = vadd.f32 %v206_v52, %v104_v16  ;;  %v2375_v57 = vadd.f32 %v279_v53, %v2335_v5 }
 0x101   :  { %v208_v0 = vpop.f32.mrf.mxu0  ;;  %v281_v60 = vpop.f32.mrf.mxu1 }
 0x102   :  { %2822 = vst [vmem:[#allocation27_spill] sm:$0xff] %v2372_v56  ;;  %2823 = vst [vmem:[#allocation28_spill] sm:$0xff] %v2375_v57  ;;  %v2377_v59 = vadd.f32 %v208_v0, %v100_v4  ;;  %v2380_v1 = vadd.f32 %v281_v60, %v2329_v63 }
 0x103   :  { %v210_v7 = vpop.f32.mrf.mxu0  ;;  %v283_v26 = vpop.f32.mrf.mxu1 }
 0x104   :  { %2824 = vst [vmem:[#allocation29_spill] sm:$0xff] %v2377_v59  ;;  %2825 = vst [vmem:[#allocation30_spill] sm:$0xff] %v2380_v1  ;;  %v2382_v39 = vadd.f32 %v210_v7, %v104_v16  ;;  %v2385_v27 = vadd.f32 %v283_v26, %v2335_v5 }
 0x105   :  { %v214_v42 = vpop.f32.mrf.mxu0  ;;  %v287_v52 = vpop.f32.mrf.mxu1 }
 0x106   :  { %2826 = vst [vmem:[#allocation31_spill] sm:$0xff] %v2382_v39  ;;  %2827 = vst [vmem:[#allocation32_spill] sm:$0xff] %v2385_v27  ;;  %v2387_v56 = vadd.f32 %v214_v42, %v100_v4  ;;  %v2390_v53 = vadd.f32 %v287_v52, %v2329_v63 }
 0x107   :  { %v216_v57 = vpop.f32.mrf.mxu0  ;;  %v289_v0 = vpop.f32.mrf.mxu1 }
 0x108   :  { %2828 = vst [vmem:[#allocation33_spill] sm:$0xff] %v2387_v56  ;;  %2829 = vst [vmem:[#allocation34_spill] sm:$0xff] %v2390_v53  ;;  %v2392_v59 = vadd.f32 %v216_v57, %v104_v16  ;;  %v2395_v60 = vadd.f32 %v289_v0, %v2335_v5  ;;  %v185_v56 = vadd.f32 %v2325_v61, %v100_v4 }
 0x109   :  { %v218_v1 = vpop.f32.mrf.mxu0  ;;  %v291_v7 = vpop.f32.mrf.mxu1  ;;  %v187_v0 = vadd.f32 %v2331_v2, %v104_v16  ;;  %v258_v2 = vadd.f32 %v2327_v62, %v2329_v63 }
 0x10a   :  { %2830 = vst [vmem:[#allocation35_spill] sm:$0xff] %v2392_v59  ;;  %2831 = vst [vmem:[#allocation36_spill] sm:$0xff] %v2395_v60  ;;  %v2397_v39 = vadd.f32 %v218_v1, %v100_v4  ;;  %v2400_v26 = vadd.f32 %v291_v7, %v2329_v63  ;;  %v260_v4 = vadd.f32 %v2333_v3, %v2335_v5  ;;  %v642_v62 = vpop.permute.xlu0 %641 }
 0x10b   :  { %v220_v27 = vpop.f32.mrf.mxu0  ;;  %v293_v42 = vpop.f32.mrf.mxu1 }
 0x10c   :  { %2832 = vst [vmem:[#allocation37_spill] sm:$0xff] %v2397_v39  ;;  %2833 = vst [vmem:[#allocation38_spill] sm:$0xff] %v2400_v26  ;;  %v2403_v52 = vadd.f32 %v220_v27, %v104_v16  ;;  %v2406_v53 = vadd.f32 %v293_v42, %v2335_v5 }
 0x10d   :  { %v561_v57 = vpop.f32.mrf.mxu0 }
 0x10e   :  { %v609_v60 = vadd.f32 %v561_v57, %v185_v56  ;;  %v602_v59 = vpop.f32.mrf.mxu1 }
 0x10f   :  { %v563_v6 = vpop.f32.mrf.mxu0  ;;  %v611_v42 = vadd.f32 %v602_v59, %v258_v2 }
 0x110   :  { %v1671_v1 = vmul.f32 -1.442695, %v609_v60  ;;  %v610_v39 = vadd.f32 %v563_v6, %v187_v0  ;;  %v604_v58 = vpop.f32.mrf.mxu1 }
 0x111   :  { %v565_v7 = vpop.f32.mrf.mxu0  ;;  %v612_v27 = vadd.f32 %v604_v58, %v260_v4 }
 0x112   :  { %1769 = vpow2.f32 %v1671_v1  ;;  %v1672_v26 = vmul.f32 -1.442695, %v610_v39  ;;  %v606_v50 = vpop.f32.mrf.mxu1  ;;  %v77_v39 = vld [vmem:[#allocation5] sm:$0xff] }
 0x113   :  { %v566_v55 = vpop.f32.mrf.mxu0  ;;  %v1673_v16 = vmul.f32 -1.442695, %v612_v27 }
 0x114   :  { %1771 = vpow2.f32 %v1672_v26  ;;  %v607_v61 = vpop.f32.mrf.mxu1 }
 0x115   :  { %1773 = vpow2.f32 %v1673_v16 }
 0x11f   :  { %v1770_v56 = vpop.eup %1769 }
 0x120   :  { %v616_v60 = vadd.f32 1.0, %v1770_v56 }
 0x121   :  { %v1772_v6 = vpop.eup %1771 }
 0x122   :  { %1775 = vrcp.f32 %v616_v60  ;;  %v622_v57 = vadd.f32 1.0, %v1772_v6  ;;  %v1774_v50 = vpop.eup %1773  ;;  %v2834_v6 = vmov 0  }
 0x123   :  { %1777 = vtanh.f32 %v611_v42  ;;  %v629_v3 = vadd.f32 1.0, %v1774_v50  ;;  %v1693_v50 = vld [vmem:[%s2803_s1 + $0x28] sm:$0xff] }
 0x124   :  { %1779 = vrcp.f32 %v622_v57  ;;  %v1685_v57 = vld [vmem:[%s2803_s1 + $0x18] sm:$0xff] }
 0x125   :  { %1781 = vrcp.f32 %v629_v3 }
 0x12f   :  { %v1776_v55 = vpop.eup %1775 }
 0x130   :  { %v1778_v26 = vpop.eup %1777 }
 0x131   :  { %v1780_v0 = vpop.eup %1779  ;;  %v633_v58 = vmul.f32 %v1778_v26, %v1776_v55  ;;  %v1701_v55 = vld [vmem:[%s2803_s1 + $0x38] sm:$0xff] }
 0x132   :  { %v632_v5 = vmul.f32 %v1780_v0, %v77_v39  ;;  %v1782_v61 = vpop.eup %1781 }
 0x134   :  { %v634_v1 = vadd.f32 %v633_v58, %v632_v5 }
 0x136   :  { %1783 = vtanh.f32 %v634_v1  ;;  %v646_v63 = vsub.f32 %v634_v1, %v77_v39 }
 0x138   :  { %v647_v59 = vmul.f32 %v646_v63, %v642_v62 }
 0x13a   :  { %v2413_v7 = vadd.f32 %v647_v59, %v77_v39 }
 0x143   :  { %v1784_v4 = vpop.eup %1783 }
 0x144   :  { %v636_v27 = vmul.f32 %v1784_v4, %v1782_v61 }
 0x146   :  { %v638_v2 = vsub.f32 %v636_v27, %v2265_v49  ;;  %v649_v16 = vmul.f32 %v642_v62, %v636_v27 }
 0x148   :  { %v644_v56 = vmul.f32 %v642_v62, %v638_v2  ;;  %650 = vst [vmem:[#allocation11] sm:$0xff] %v649_v16 }
 0x14a   :  { %v2417_v42 = vadd.f32 %v644_v56, %v2265_v49  ;;  %v1681_v49 = vld [vmem:[%s2803_s1 + $0x10] sm:$0xff]  ;;  %s2063_s1 = smov [#allocation11]  }
 0x14b   :  { %904 = vperm.xlu1 %1714, %v1681_v49   ;;  %s1587_s11 = sshll.u32 %s2063_s1, 4  ;;  %s1588_s11 = int_to_ptr.vmem [resolvable:$true] %s1587_s11 }
 0x14c   :  { %v656_v60 = vpack.c.bf16 %v2417_v42, %v2417_v42  ;;  %s1989_s16 = scalar_lea.vmem %s1588_s11, 1024  ;;  %p1994_p2 = scmp.lt.s32.totalorder %s1588_s11, %s1588_s11 }
 0x14d   :  { %p1990_p1 = scmp.ne.s32.totalorder %s1588_s11, %s1989_s16  ;;  %p1995_p3 = scmp.lt.s32.totalorder %s1989_s16, %s1989_s16 }
 0x14e   :  { %690 = vmatmul.mubr.bf16.vlgmr.msra.gmra.mxu0 %v656_v60  ;;  %731 = vmatmul.mubr.bf16.vlgmr.msra.gmra.mxu1 %v656_v60 }
 0x14f   :  { %790 = vmatpush1.bf16.msra.mxu0 %v2141_v10  ;;  %831 = vmatpush1.bf16.msra.mxu1 %v2143_v11  ;;  %p1996_p4 = por %p1995_p3, %p1994_p2 }
 0x150   :  { %791 = vmatprep.subr.bf16.mxu0 %v2146_v12  ;;  %832 = vmatprep.subr.bf16.mxu1 %v2150_v13 }
 0x151   :  { %821 = vmatprep.mubr.bf16.mxu0 %v2834_v6  ;;  %862 = vmatprep.mubr.bf16.mxu1 %v2834_v6  ;;  %p1997_p5 = pnand %p1996_p4, %p1990_p1 }
 0x152   :  { %1036 = vperm.xlu1 %1714, %v1685_v57  }
 0x153   :  { %792 = vmatpush1.bf16.msra.mxu0 %v2154_v14  ;;  %833 = vmatpush1.bf16.msra.mxu1 %v2156_v15 }
 0x154   :  { %793 = vmatprep.subr.bf16.mxu0 %v2168_v18  ;;  %834 = vmatprep.subr.bf16.mxu1 %v2171_v20 }
 0x156   :  { %1300 = vperm.xlu1 %1714, %v1693_v50  }
 0x157   :  { %794 = vmatpush1.bf16.msra.mxu0 %v2173_v21  ;;  %835 = vmatpush1.bf16.msra.mxu1 %v2176_v22 }
 0x158   :  { %795 = vmatprep.subr.bf16.mxu0 %v2180_v23  ;;  %836 = vmatprep.subr.bf16.mxu1 %v2183_v24 }
 0x15a   :  { %1564 = vperm.xlu1 %1714, %v1701_v55  }
 0x15b   :  { %796 = vmatpush1.bf16.msra.mxu0 %v2185_v25  ;;  %837 = vmatpush1.bf16.msra.mxu1 %v2199_v28 }
 0x15c   :  { %797 = vmatprep.subr.bf16.mxu0 %v2201_v29  ;;  %838 = vmatprep.subr.bf16.mxu1 %v2205_v30 }
 0x15f   :  { %798 = vmatpush1.bf16.msra.mxu0 %v2208_v32  ;;  %839 = vmatpush1.bf16.msra.mxu1 %v2210_v33 }
 0x160   :  { %799 = vmatprep.subr.bf16.mxu0 %v2214_v34  ;;  %840 = vmatprep.subr.bf16.mxu1 %v2217_v35 }
 0x163   :  { %800 = vmatpush1.bf16.msra.mxu0 %v2221_v36  ;;  %841 = vmatpush1.bf16.msra.mxu1 %v2223_v37 }
 0x164   :  { %801 = vmatprep.subr.bf16.mxu0 %v2235_v40  ;;  %842 = vmatprep.subr.bf16.mxu1 %v2239_v41 }
 0x167   :  { %802 = vmatpush1.bf16.msra.mxu0 %v2245_v44  ;;  %843 = vmatpush1.bf16.msra.mxu1 %v2249_v45 }
 0x168   :  { %803 = vmatprep.subr.bf16.mxu0 %v2251_v46  ;;  %844 = vmatprep.subr.bf16.mxu1 %v2254_v47 }
 0x16b   :  { %804 = vmatpush1.bf16.msra.mxu0 %v2259_v48  ;;  %845 = vmatpush1.bf16.msra.mxu1 %v2272_v51 }
 0x16c   :  { %921 = vmatprep.subr.bf16.mxu0 %v2137_v8  ;;  %962 = vmatprep.subr.bf16.mxu1 %v2139_v9 }
 0x20e   :  { %v691_v39 = vpop.f32.mrf.mxu0  ;;  %v732_v26 = vpop.f32.mrf.mxu1 }
 0x20f   :  { %v739_v0 = vadd.f32 %v691_v39, %v2337_v17  ;;  %v741_v2 = vadd.f32 %v732_v26, %v2340_v19  ;;  %v773_v26 = vpop.permute.xlu0 %772 }
 0x210   :  { %v693_v3 = vpop.f32.mrf.mxu0  ;;  %v734_v5 = vpop.f32.mrf.mxu1 }
 0x211   :  { %v1674_v58 = vmul.f32 -1.442695, %v739_v0  ;;  %v740_v1 = vadd.f32 %v693_v3, %v2342_v31  ;;  %v742_v27 = vadd.f32 %v734_v5, %v2345_v38 }
 0x212   :  { %v695_v62 = vpop.f32.mrf.mxu0  ;;  %v736_v63 = vpop.f32.mrf.mxu1 }
 0x213   :  { %1785 = vpow2.f32 %v1674_v58  ;;  %v1675_v59 = vmul.f32 -1.442695, %v740_v1  ;;  %v1676_v16 = vmul.f32 -1.442695, %v742_v27 }
 0x214   :  { %v696_v61 = vpop.f32.mrf.mxu0  ;;  %v737_v4 = vpop.f32.mrf.mxu1 }
 0x215   :  { %1787 = vpow2.f32 %v1675_v59 }
 0x216   :  { %1789 = vtanh.f32 %v741_v2 }
 0x217   :  { %1791 = vpow2.f32 %v1676_v16 }
 0x220   :  { %v1786_v56 = vpop.eup %1785 }
 0x221   :  { %v746_v60 = vadd.f32 1.0, %v1786_v56 }
 0x222   :  { %v1788_v17 = vpop.eup %1787 }
 0x223   :  { %1793 = vrcp.f32 %v746_v60  ;;  %v752_v49 = vadd.f32 1.0, %v1788_v17  ;;  %v1790_v31 = vpop.eup %1789 }
 0x224   :  { %v1792_v57 = vpop.eup %1791 }
 0x225   :  { %1795 = vrcp.f32 %v752_v49  ;;  %v759_v0 = vadd.f32 1.0, %v1792_v57 }
 0x227   :  { %1797 = vrcp.f32 %v759_v0  ;;  %v2835_v0 = vld [vmem:[#allocation20_spill] sm:$0xff] }
 0x230   :  { %v1794_v50 = vpop.eup %1793 }
 0x231   :  { %v763_v55 = vmul.f32 %v1794_v50, %v1790_v31 }
 0x232   :  { %v1796_v39 = vpop.eup %1795 }
 0x233   :  { %v762_v3 = vmul.f32 %v1796_v39, %v2413_v7 }
 0x234   :  { %v1798_v1 = vpop.eup %1797 }
 0x235   :  { %v764_v38 = vadd.f32 %v763_v55, %v762_v3 }
 0x237   :  { %1799 = vtanh.f32 %v764_v38  ;;  %v777_v19 = vsub.f32 %v764_v38, %v2413_v7  ;;  %v2836_v38 = vld [vmem:[#allocation19_spill] sm:$0xff] }
 0x239   :  { %v778_v5 = vmul.f32 %v777_v19, %v773_v26 }
 0x23b   :  { %v2474_v58 = vadd.f32 %v778_v5, %v2413_v7 }
 0x244   :  { %v1800_v62 = vpop.eup %1799 }
 0x245   :  { %v766_v63 = vmul.f32 %v1800_v62, %v1798_v1 }
 0x247   :  { %v769_v59 = vsub.f32 %v766_v63, %v2417_v42  ;;  %v780_v61 = vmul.f32 %v773_v26, %v766_v63 }
 0x249   :  { %v775_v4 = vmul.f32 %v773_v26, %v769_v59  ;;  %782 = vst [vmem:[#allocation11 + $0x8] sm:$0xff] %v780_v61 }
 0x24b   :  { %v2478_v27 = vadd.f32 %v775_v4, %v2417_v42 }
 0x24d   :  { %v788_v2 = vpack.c.bf16 %v2478_v27, %v2478_v27 }
 0x24f   :  { %822 = vmatmul.mubr.bf16.vlgmr.msra.gmra.mxu0 %v788_v2  ;;  %863 = vmatmul.mubr.bf16.vlgmr.msra.gmra.mxu1 %v788_v2 }
 0x250   :  { %922 = vmatpush1.bf16.msra.mxu0 %v2141_v10  ;;  %963 = vmatpush1.bf16.msra.mxu1 %v2143_v11 }
 0x251   :  { %923 = vmatprep.subr.bf16.mxu0 %v2146_v12  ;;  %964 = vmatprep.subr.bf16.mxu1 %v2150_v13 }
 0x252   :  { %953 = vmatprep.mubr.bf16.mxu0 %v2834_v6  ;;  %994 = vmatprep.mubr.bf16.mxu1 %v2834_v6 }
 0x254   :  { %924 = vmatpush1.bf16.msra.mxu0 %v2154_v14  ;;  %965 = vmatpush1.bf16.msra.mxu1 %v2156_v15 }
 0x255   :  { %925 = vmatprep.subr.bf16.mxu0 %v2168_v18  ;;  %966 = vmatprep.subr.bf16.mxu1 %v2171_v20 }
 0x258   :  { %926 = vmatpush1.bf16.msra.mxu0 %v2173_v21  ;;  %967 = vmatpush1.bf16.msra.mxu1 %v2176_v22 }
 0x259   :  { %927 = vmatprep.subr.bf16.mxu0 %v2180_v23  ;;  %968 = vmatprep.subr.bf16.mxu1 %v2183_v24 }
 0x25c   :  { %928 = vmatpush1.bf16.msra.mxu0 %v2185_v25  ;;  %969 = vmatpush1.bf16.msra.mxu1 %v2199_v28 }
 0x25d   :  { %929 = vmatprep.subr.bf16.mxu0 %v2201_v29  ;;  %970 = vmatprep.subr.bf16.mxu1 %v2205_v30 }
 0x260   :  { %930 = vmatpush1.bf16.msra.mxu0 %v2208_v32  ;;  %971 = vmatpush1.bf16.msra.mxu1 %v2210_v33 }
 0x261   :  { %931 = vmatprep.subr.bf16.mxu0 %v2214_v34  ;;  %972 = vmatprep.subr.bf16.mxu1 %v2217_v35 }
 0x264   :  { %932 = vmatpush1.bf16.msra.mxu0 %v2221_v36  ;;  %973 = vmatpush1.bf16.msra.mxu1 %v2223_v37 }
 0x265   :  { %933 = vmatprep.subr.bf16.mxu0 %v2235_v40  ;;  %974 = vmatprep.subr.bf16.mxu1 %v2239_v41 }
 0x268   :  { %934 = vmatpush1.bf16.msra.mxu0 %v2245_v44  ;;  %975 = vmatpush1.bf16.msra.mxu1 %v2249_v45 }
 0x269   :  { %935 = vmatprep.subr.bf16.mxu0 %v2251_v46  ;;  %976 = vmatprep.subr.bf16.mxu1 %v2254_v47 }
 0x26c   :  { %936 = vmatpush1.bf16.msra.mxu0 %v2259_v48  ;;  %977 = vmatpush1.bf16.msra.mxu1 %v2272_v51 }
 0x26d   :  { %1053 = vmatprep.subr.bf16.mxu0 %v2137_v8  ;;  %1094 = vmatprep.subr.bf16.mxu1 %v2139_v9 }
 0x30f   :  { %v823_v7 = vpop.f32.mrf.mxu0  ;;  %v864_v42 = vpop.f32.mrf.mxu1 }
 0x310   :  { %v871_v16 = vadd.f32 %v823_v7, %v2347_v43  ;;  %v873_v19 = vadd.f32 %v864_v42, %v2836_v38  ;;  %v905_v42 = vpop.permute.xlu1 %904  ;;  %v2840_v38 = vld [vmem:[#allocation22_spill] sm:$0xff] }
 0x311   :  { %v825_v56 = vpop.f32.mrf.mxu0  ;;  %v866_v60 = vpop.f32.mrf.mxu1 }
 0x312   :  { %v1678_v17 = vmul.f32 -1.442695, %v871_v16  ;;  %v872_v49 = vadd.f32 %v825_v56, %v2352_v54  ;;  %v874_v3 = vadd.f32 %v866_v60, %v2835_v0 }
 0x313   :  { %v827_v31 = vpop.f32.mrf.mxu0  ;;  %v868_v57 = vpop.f32.mrf.mxu1 }
 0x314   :  { %1801 = vpow2.f32 %v1678_v17  ;;  %v1679_v50 = vmul.f32 -1.442695, %v872_v49  ;;  %v1680_v26 = vmul.f32 -1.442695, %v874_v3 }
 0x315   :  { %v828_v55 = vpop.f32.mrf.mxu0  ;;  %v869_v39 = vpop.f32.mrf.mxu1 }
 0x316   :  { %1803 = vpow2.f32 %v1679_v50 }
 0x317   :  { %1805 = vtanh.f32 %v873_v19 }
 0x318   :  { %1807 = vpow2.f32 %v1680_v26 }
 0x321   :  { %v1802_v5 = vpop.eup %1801 }
 0x322   :  { %v878_v1 = vadd.f32 1.0, %v1802_v5 }
 0x323   :  { %v1804_v43 = vpop.eup %1803 }
 0x324   :  { %1809 = vrcp.f32 %v878_v1  ;;  %v884_v62 = vadd.f32 1.0, %v1804_v43  ;;  %v1806_v54 = vpop.eup %1805 }
 0x325   :  { %v1808_v63 = vpop.eup %1807 }
 0x326   :  { %1811 = vrcp.f32 %v884_v62  ;;  %v891_v2 = vadd.f32 1.0, %v1808_v63 }
 0x328   :  { %1813 = vrcp.f32 %v891_v2 }
 0x331   :  { %v1810_v59 = vpop.eup %1809 }
 0x332   :  { %v895_v61 = vmul.f32 %v1810_v59, %v1806_v54 }
 0x333   :  { %v1812_v4 = vpop.eup %1811 }
 0x334   :  { %v894_v7 = vmul.f32 %v1812_v4, %v2474_v58 }
 0x335   :  { %v1814_v49 = vpop.eup %1813 }
 0x336   :  { %v896_v16 = vadd.f32 %v895_v61, %v894_v7 }
 0x338   :  { %1815 = vtanh.f32 %v896_v16  ;;  %v909_v56 = vsub.f32 %v896_v16, %v2474_v58 }
 0x33a   :  { %v910_v60 = vmul.f32 %v909_v56, %v905_v42 }
 0x33c   :  { %v2523_v17 = vadd.f32 %v910_v60, %v2474_v58 }
 0x345   :  { %v1816_v31 = vpop.eup %1815 }
 0x346   :  { %v898_v57 = vmul.f32 %v1816_v31, %v1814_v49 }
 0x348   :  { %v901_v50 = vsub.f32 %v898_v57, %v2478_v27  ;;  %v912_v55 = vmul.f32 %v905_v42, %v898_v57 }
 0x34a   :  { %v907_v39 = vmul.f32 %v905_v42, %v901_v50  ;;  %914 = vst [vmem:[#allocation11 + $0x10] sm:$0xff] %v912_v55  ;;  %v1037_v42 = vpop.permute.xlu1 %1036 }
 0x34c   :  { %v2527_v0 = vadd.f32 %v907_v39, %v2478_v27  ;;  %v2839_v27 = vld [vmem:[#allocation24_spill] sm:$0xff] }
 0x34e   :  { %v920_v3 = vpack.c.bf16 %v2527_v0, %v2527_v0 }
 0x350   :  { %954 = vmatmul.mubr.bf16.vlgmr.msra.gmra.mxu0 %v920_v3  ;;  %995 = vmatmul.mubr.bf16.vlgmr.msra.gmra.mxu1 %v920_v3 }
 0x351   :  { %1054 = vmatpush1.bf16.msra.mxu0 %v2141_v10  ;;  %1095 = vmatpush1.bf16.msra.mxu1 %v2143_v11 }
 0x352   :  { %1055 = vmatprep.subr.bf16.mxu0 %v2146_v12  ;;  %1096 = vmatprep.subr.bf16.mxu1 %v2150_v13  ;;  %v2837_v12 = vld [vmem:[#allocation21_spill] sm:$0xff] }
 0x353   :  { %1085 = vmatprep.mubr.bf16.mxu0 %v2834_v6  ;;  %1126 = vmatprep.mubr.bf16.mxu1 %v2834_v6 }
 0x355   :  { %1056 = vmatpush1.bf16.msra.mxu0 %v2154_v14  ;;  %1097 = vmatpush1.bf16.msra.mxu1 %v2156_v15 }
 0x356   :  { %1057 = vmatprep.subr.bf16.mxu0 %v2168_v18  ;;  %1098 = vmatprep.subr.bf16.mxu1 %v2171_v20  ;;  %v2838_v20 = vld [vmem:[#allocation23_spill] sm:$0xff] }
 0x359   :  { %1058 = vmatpush1.bf16.msra.mxu0 %v2173_v21  ;;  %1099 = vmatpush1.bf16.msra.mxu1 %v2176_v22 }
 0x35a   :  { %1059 = vmatprep.subr.bf16.mxu0 %v2180_v23  ;;  %1100 = vmatprep.subr.bf16.mxu1 %v2183_v24 }
 0x35d   :  { %1060 = vmatpush1.bf16.msra.mxu0 %v2185_v25  ;;  %1101 = vmatpush1.bf16.msra.mxu1 %v2199_v28 }
 0x35e   :  { %1061 = vmatprep.subr.bf16.mxu0 %v2201_v29  ;;  %1102 = vmatprep.subr.bf16.mxu1 %v2205_v30 }
 0x361   :  { %1062 = vmatpush1.bf16.msra.mxu0 %v2208_v32  ;;  %1103 = vmatpush1.bf16.msra.mxu1 %v2210_v33 }
 0x362   :  { %1063 = vmatprep.subr.bf16.mxu0 %v2214_v34  ;;  %1104 = vmatprep.subr.bf16.mxu1 %v2217_v35 }
 0x365   :  { %1064 = vmatpush1.bf16.msra.mxu0 %v2221_v36  ;;  %1105 = vmatpush1.bf16.msra.mxu1 %v2223_v37 }
 0x366   :  { %1065 = vmatprep.subr.bf16.mxu0 %v2235_v40  ;;  %1106 = vmatprep.subr.bf16.mxu1 %v2239_v41 }
 0x369   :  { %1066 = vmatpush1.bf16.msra.mxu0 %v2245_v44  ;;  %1107 = vmatpush1.bf16.msra.mxu1 %v2249_v45 }
 0x36a   :  { %1067 = vmatprep.subr.bf16.mxu0 %v2251_v46  ;;  %1108 = vmatprep.subr.bf16.mxu1 %v2254_v47 }
 0x36d   :  { %1068 = vmatpush1.bf16.msra.mxu0 %v2259_v48  ;;  %1109 = vmatpush1.bf16.msra.mxu1 %v2272_v51 }
 0x36e   :  { %1185 = vmatprep.subr.bf16.mxu0 %v2137_v8  ;;  %1226 = vmatprep.subr.bf16.mxu1 %v2139_v9 }
 0x410   :  { %v955_v10 = vpop.f32.mrf.mxu0  ;;  %v996_v11 = vpop.f32.mrf.mxu1 }
 0x411   :  { %v1003_v13 = vadd.f32 %v955_v10, %v2837_v12  ;;  %v1005_v9 = vadd.f32 %v996_v11, %v2840_v38  ;;  %v2580_v11 = vld [vmem:[#allocation10 + $0xe0] ss:$16 sps:$4 sm:$0xff]   ;;  %v2586_v12 = vld [vmem:[#allocation10 + $0xc4] ss:$16 sps:$4 sm:$0xff]  }
 0x412   :  { %v957_v14 = vpop.f32.mrf.mxu0  ;;  %v998_v15 = vpop.f32.mrf.mxu1 }
 0x413   :  { %v1682_v18 = vmul.f32 -1.442695, %v1003_v13  ;;  %v1004_v21 = vadd.f32 %v957_v14, %v2838_v20  ;;  %v1006_v8 = vadd.f32 %v998_v15, %v2839_v27  ;;  %v2589_v13 = vld [vmem:[#allocation10 + $0xcc] ss:$16 sps:$4 sm:$0xff]   ;;  %v2597_v14 = vld [vmem:[#allocation10 + $0xc8] ss:$16 sps:$4 sm:$0xff]  }
 0x414   :  { %v959_v22 = vpop.f32.mrf.mxu0  ;;  %v1000_v23 = vpop.f32.mrf.mxu1  ;;  %v2600_v15 = vld [vmem:[#allocation10 + $0xa4] ss:$16 sps:$4 sm:$0xff]   ;;  %v2606_v20 = vld [vmem:[#allocation10 + $0xa0] ss:$16 sps:$4 sm:$0xff]  }
 0x415   :  { %1817 = vpow2.f32 %v1682_v18  ;;  %v1683_v24 = vmul.f32 -1.442695, %v1004_v21  ;;  %v1684_v19 = vmul.f32 -1.442695, %v1006_v8  ;;  %v2603_v18 = vld [vmem:[#allocation10 + $0xac] ss:$16 sps:$4 sm:$0xff]  }
 0x416   :  { %v960_v25 = vpop.f32.mrf.mxu0  ;;  %v1001_v58 = vpop.f32.mrf.mxu1  ;;  %v2609_v21 = vld [vmem:[#allocation10 + $0xa8] ss:$16 sps:$4 sm:$0xff]   ;;  %v2612_v22 = vld [vmem:[#allocation10 + $0x84] ss:$16 sps:$4 sm:$0xff]   ;;  %v2615_v23 = vld [vmem:[#allocation10 + $0x8c] ss:$16 sps:$4 sm:$0xff]  }
 0x417   :  { %1819 = vpow2.f32 %v1683_v24  ;;  %v2618_v24 = vld [vmem:[#allocation10 + $0x80] ss:$16 sps:$4 sm:$0xff]   ;;  %v2844_v58 = vld [vmem:[#allocation26_spill] sm:$0xff] }
 0x418   :  { %1821 = vtanh.f32 %v1005_v9 }
 0x419   :  { %1823 = vpow2.f32 %v1684_v19 }
 0x422   :  { %v1818_v26 = vpop.eup %1817 }
 0x423   :  { %v1010_v5 = vadd.f32 1.0, %v1818_v26 }
 0x424   :  { %v1820_v1 = vpop.eup %1819 }
 0x425   :  { %1825 = vrcp.f32 %v1010_v5  ;;  %v1016_v43 = vadd.f32 1.0, %v1820_v1  ;;  %v1822_v62 = vpop.eup %1821 }
 0x426   :  { %v1824_v54 = vpop.eup %1823 }
 0x427   :  { %1827 = vrcp.f32 %v1016_v43  ;;  %v1023_v4 = vadd.f32 1.0, %v1824_v54 }
 0x429   :  { %1829 = vrcp.f32 %v1023_v4 }
 0x432   :  { %v1826_v63 = vpop.eup %1825 }
 0x433   :  { %v1027_v59 = vmul.f32 %v1826_v63, %v1822_v62 }
 0x434   :  { %v1828_v61 = vpop.eup %1827 }
 0x435   :  { %v1026_v2 = vmul.f32 %v1828_v61, %v2523_v17 }
 0x436   :  { %v1830_v49 = vpop.eup %1829 }
 0x437   :  { %v1028_v7 = vadd.f32 %v1027_v59, %v1026_v2  ;;  %v1169_v2 = vpop.permute.xlu0 %1168 }
 0x439   :  { %1831 = vtanh.f32 %v1028_v7  ;;  %v1041_v16 = vsub.f32 %v1028_v7, %v2523_v17 }
 0x43b   :  { %v1042_v56 = vmul.f32 %v1041_v16, %v1037_v42 }
 0x43d   :  { %v2572_v60 = vadd.f32 %v1042_v56, %v2523_v17  ;;  %v2583_v17 = vld [vmem:[#allocation10 + $0xe8] ss:$16 sps:$4 sm:$0xff]  }
 0x446   :  { %v1832_v31 = vpop.eup %1831 }
 0x447   :  { %v1030_v57 = vmul.f32 %v1832_v31, %v1830_v49 }
 0x449   :  { %v1033_v50 = vsub.f32 %v1030_v57, %v2527_v0  ;;  %v1044_v55 = vmul.f32 %v1037_v42, %v1030_v57 }
 0x44b   :  { %v1039_v39 = vmul.f32 %v1037_v42, %v1033_v50  ;;  %1046 = vst [vmem:[#allocation11 + $0x18] sm:$0xff] %v1044_v55 }
 0x44d   :  { %v2576_v3 = vadd.f32 %v1039_v39, %v2527_v0  ;;  %v2594_v0 = vld [vmem:[#allocation10 + $0xc0] ss:$16 sps:$4 sm:$0xff]  }
 0x44f   :  { %v1052_v10 = vpack.c.bf16 %v2576_v3, %v2576_v3 }
 0x451   :  { %1086 = vmatmul.mubr.bf16.vlgmr.msra.gmra.mxu0 %v1052_v10  ;;  %1127 = vmatmul.mubr.bf16.vlgmr.msra.gmra.mxu1 %v1052_v10  ;;  %v2680_v10 = vld [vmem:[#allocation10 + $0x6c] ss:$16 sps:$4 sm:$0xff]  }
 0x452   :  { %1186 = vmatpush1.bf16.msra.mxu0 %v2580_v11  ;;  %1227 = vmatpush1.bf16.msra.mxu1 %v2583_v17 }
 0x453   :  { %1187 = vmatprep.subr.bf16.mxu0 %v2586_v12  ;;  %1228 = vmatprep.subr.bf16.mxu1 %v2589_v13 }
 0x454   :  { %1217 = vmatprep.mubr.bf16.mxu0 %v2834_v6  ;;  %1258 = vmatprep.mubr.bf16.mxu1 %v2834_v6 }
 0x456   :  { %1188 = vmatpush1.bf16.msra.mxu0 %v2594_v0  ;;  %1229 = vmatpush1.bf16.msra.mxu1 %v2597_v14 }
 0x457   :  { %1189 = vmatprep.subr.bf16.mxu0 %v2600_v15  ;;  %1230 = vmatprep.subr.bf16.mxu1 %v2603_v18 }
 0x45a   :  { %1190 = vmatpush1.bf16.msra.mxu0 %v2606_v20  ;;  %1231 = vmatpush1.bf16.msra.mxu1 %v2609_v21 }
 0x45b   :  { %1191 = vmatprep.subr.bf16.mxu0 %v2612_v22  ;;  %1232 = vmatprep.subr.bf16.mxu1 %v2615_v23 }
 0x45e   :  { %1192 = vmatpush1.bf16.msra.mxu0 %v2618_v24  ;;  %1233 = vmatpush1.bf16.msra.mxu1 %v2199_v28  ;;  %v2638_v28 = vld [vmem:[#allocation10 + $0xe4] ss:$16 sps:$4 sm:$0xff]  }
 0x45f   :  { %1193 = vmatprep.subr.bf16.mxu0 %v2201_v29  ;;  %1234 = vmatprep.subr.bf16.mxu1 %v2205_v30  ;;  %v2641_v29 = vld [vmem:[#allocation10 + $0xec] ss:$16 sps:$4 sm:$0xff]  }
 0x462   :  { %1194 = vmatpush1.bf16.msra.mxu0 %v2208_v32  ;;  %1235 = vmatpush1.bf16.msra.mxu1 %v2210_v33  ;;  %v2841_v33 = vld [vmem:[#allocation25_spill] sm:$0xff] }
 0x463   :  { %1195 = vmatprep.subr.bf16.mxu0 %v2214_v34  ;;  %1236 = vmatprep.subr.bf16.mxu1 %v2217_v35 }
 0x466   :  { %1196 = vmatpush1.bf16.msra.mxu0 %v2221_v36  ;;  %1237 = vmatpush1.bf16.msra.mxu1 %v2223_v37 }
 0x467   :  { %1197 = vmatprep.subr.bf16.mxu0 %v2235_v40  ;;  %1238 = vmatprep.subr.bf16.mxu1 %v2239_v41  ;;  %v2842_v40 = vld [vmem:[#allocation27_spill] sm:$0xff] }
 0x46a   :  { %1198 = vmatpush1.bf16.msra.mxu0 %v2245_v44  ;;  %1239 = vmatpush1.bf16.msra.mxu1 %v2249_v45 }
 0x46b   :  { %1199 = vmatprep.subr.bf16.mxu0 %v2251_v46  ;;  %1240 = vmatprep.subr.bf16.mxu1 %v2254_v47 }
 0x46e   :  { %1200 = vmatpush1.bf16.msra.mxu0 %v2259_v48  ;;  %1241 = vmatpush1.bf16.msra.mxu1 %v2272_v51  ;;  %v2843_v51 = vld [vmem:[#allocation28_spill] sm:$0xff] }
 0x46f   :  { %1317 = vmatprep.subr.bf16.mxu0 %v2638_v28  ;;  %1358 = vmatprep.subr.bf16.mxu1 %v2641_v29 }
 0x511   :  { %v1087_v30 = vpop.f32.mrf.mxu0  ;;  %v1128_v32 = vpop.f32.mrf.mxu1 }
 0x512   :  { %v1135_v34 = vadd.f32 %v1087_v30, %v2841_v33  ;;  %v1137_v27 = vadd.f32 %v1128_v32, %v2844_v58  ;;  %v2683_v30 = vld [vmem:[#allocation10 + $0x60] ss:$16 sps:$4 sm:$0xff]   ;;  %v2686_v32 = vld [vmem:[#allocation10 + $0x68] ss:$16 sps:$4 sm:$0xff]   ;;  %v2689_v33 = vld [vmem:[#allocation10 + $0x44] ss:$16 sps:$4 sm:$0xff]  }
 0x513   :  { %v1089_v35 = vpop.f32.mrf.mxu0  ;;  %v1130_v36 = vpop.f32.mrf.mxu1  ;;  %v2845_v58 = vld [vmem:[#allocation29_spill] sm:$0xff] }
 0x514   :  { %v1686_v37 = vmul.f32 -1.442695, %v1135_v34  ;;  %v1136_v41 = vadd.f32 %v1089_v35, %v2842_v40  ;;  %v1138_v25 = vadd.f32 %v1130_v36, %v2843_v51  ;;  %v2692_v34 = vld [vmem:[#allocation10 + $0x4c] ss:$16 sps:$4 sm:$0xff]   ;;  %v2695_v35 = vld [vmem:[#allocation10 + $0x40] ss:$16 sps:$4 sm:$0xff]  }
 0x515   :  { %v1091_v44 = vpop.f32.mrf.mxu0  ;;  %v1132_v45 = vpop.f32.mrf.mxu1  ;;  %v2698_v36 = vld [vmem:[#allocation10 + $0x48] ss:$16 sps:$4 sm:$0xff]   ;;  %v2704_v40 = vld [vmem:[#allocation10 + $0x2c] ss:$16 sps:$4 sm:$0xff]  }
 0x516   :  { %1833 = vpow2.f32 %v1686_v37  ;;  %v1687_v46 = vmul.f32 -1.442695, %v1136_v41  ;;  %v1688_v8 = vmul.f32 -1.442695, %v1138_v25  ;;  %v2701_v37 = vld [vmem:[#allocation10 + $0x24] ss:$16 sps:$4 sm:$0xff]  }
 0x517   :  { %v1092_v47 = vpop.f32.mrf.mxu0  ;;  %v1133_v48 = vpop.f32.mrf.mxu1  ;;  %v2707_v41 = vld [vmem:[#allocation10 + $0x20] ss:$16 sps:$4 sm:$0xff]   ;;  %v2710_v44 = vld [vmem:[#allocation10 + $0x28] ss:$16 sps:$4 sm:$0xff]   ;;  %v2713_v45 = vld [vmem:[#allocation10 + $0x4] ss:$16 sps:$4 sm:$0xff]  }
 0x518   :  { %1835 = vpow2.f32 %v1687_v46  ;;  %v2716_v46 = vld [vmem:[#allocation10 + $0xc] ss:$16 sps:$4 sm:$0xff]   ;;  %v2719_v47 = vld [vmem:[#allocation10] ss:$16 sps:$4 sm:$0xff]   ;;  %v2722_v48 = vld [vmem:[#allocation10 + $0x8] ss:$16 sps:$4 sm:$0xff]  }
 0x519   :  { %1837 = vtanh.f32 %v1137_v27 }
 0x51a   :  { %1839 = vpow2.f32 %v1688_v8 }
 0x523   :  { %v1834_v38 = vpop.eup %1833 }
 0x524   :  { %v1142_v9 = vadd.f32 1.0, %v1834_v38 }
 0x525   :  { %v1836_v19 = vpop.eup %1835 }
 0x526   :  { %1841 = vrcp.f32 %v1142_v9  ;;  %v1148_v26 = vadd.f32 1.0, %v1836_v19  ;;  %v1838_v5 = vpop.eup %1837  ;;  %v2846_v19 = vld [vmem:[#allocation31_spill] sm:$0xff] }
 0x527   :  { %v1840_v1 = vpop.eup %1839 }
 0x528   :  { %1843 = vrcp.f32 %v1148_v26  ;;  %v1155_v63 = vadd.f32 1.0, %v1840_v1 }
 0x52a   :  { %1845 = vrcp.f32 %v1155_v63  ;;  %v2847_v63 = vld [vmem:[#allocation32_spill] sm:$0xff] }
 0x533   :  { %v1842_v43 = vpop.eup %1841 }
 0x534   :  { %v1159_v62 = vmul.f32 %v1842_v43, %v1838_v5 }
 0x535   :  { %v1844_v54 = vpop.eup %1843 }
 0x536   :  { %v1158_v59 = vmul.f32 %v1844_v54, %v2572_v60 }
 0x537   :  { %v1846_v42 = vpop.eup %1845 }
 0x538   :  { %v1160_v61 = vadd.f32 %v1159_v62, %v1158_v59  ;;  %v2848_v59 = vld [vmem:[#allocation30_spill] sm:$0xff] }
 0x53a   :  { %1847 = vtanh.f32 %v1160_v61  ;;  %v1173_v4 = vsub.f32 %v1160_v61, %v2572_v60 }
 0x53c   :  { %v1174_v7 = vmul.f32 %v1173_v4, %v1169_v2 }
 0x53e   :  { %v2651_v16 = vadd.f32 %v1174_v7, %v2572_v60  ;;  %v2674_v60 = vld [vmem:[#allocation10 + $0x88] ss:$16 sps:$4 sm:$0xff]  }
 0x547   :  { %v1848_v56 = vpop.eup %1847 }
 0x548   :  { %v1162_v49 = vmul.f32 %v1848_v56, %v1846_v42 }
 0x54a   :  { %v1165_v31 = vsub.f32 %v1162_v49, %v2576_v3  ;;  %v1176_v57 = vmul.f32 %v1169_v2, %v1162_v49 }
 0x54c   :  { %v1171_v50 = vmul.f32 %v1169_v2, %v1165_v31  ;;  %1178 = vst [vmem:[#allocation11 + $0x20] sm:$0xff] %v1176_v57 }
 0x54e   :  { %v2655_v55 = vadd.f32 %v1171_v50, %v2576_v3  ;;  %v2677_v3 = vld [vmem:[#allocation10 + $0x64] ss:$16 sps:$4 sm:$0xff]  }
 0x550   :  { %v1184_v39 = vpack.c.bf16 %v2655_v55, %v2655_v55 }
 0x552   :  { %1218 = vmatmul.mubr.bf16.vlgmr.msra.gmra.mxu0 %v1184_v39  ;;  %1259 = vmatmul.mubr.bf16.vlgmr.msra.gmra.mxu1 %v1184_v39 }
 0x553   :  { %1318 = vmatpush1.bf16.msra.mxu0 %v2580_v11  ;;  %1359 = vmatpush1.bf16.msra.mxu1 %v2583_v17 }
 0x554   :  { %1319 = vmatprep.subr.bf16.mxu0 %v2586_v12  ;;  %1360 = vmatprep.subr.bf16.mxu1 %v2589_v13 }
 0x555   :  { %1349 = vmatprep.mubr.bf16.mxu0 %v2834_v6  ;;  %1390 = vmatprep.mubr.bf16.mxu1 %v2834_v6 }
 0x557   :  { %1320 = vmatpush1.bf16.msra.mxu0 %v2594_v0  ;;  %1361 = vmatpush1.bf16.msra.mxu1 %v2597_v14 }
 0x558   :  { %1321 = vmatprep.subr.bf16.mxu0 %v2600_v15  ;;  %1362 = vmatprep.subr.bf16.mxu1 %v2603_v18 }
 0x55b   :  { %1322 = vmatpush1.bf16.msra.mxu0 %v2606_v20  ;;  %1363 = vmatpush1.bf16.msra.mxu1 %v2609_v21 }
 0x55c   :  { %1323 = vmatprep.subr.bf16.mxu0 %v2612_v22  ;;  %1364 = vmatprep.subr.bf16.mxu1 %v2615_v23 }
 0x55f   :  { %1324 = vmatpush1.bf16.msra.mxu0 %v2618_v24  ;;  %1365 = vmatpush1.bf16.msra.mxu1 %v2674_v60 }
 0x560   :  { %1325 = vmatprep.subr.bf16.mxu0 %v2677_v3  ;;  %1366 = vmatprep.subr.bf16.mxu1 %v2680_v10 }
 0x563   :  { %1326 = vmatpush1.bf16.msra.mxu0 %v2683_v30  ;;  %1367 = vmatpush1.bf16.msra.mxu1 %v2686_v32 }
 0x564   :  { %1327 = vmatprep.subr.bf16.mxu0 %v2689_v33  ;;  %1368 = vmatprep.subr.bf16.mxu1 %v2692_v34 }
 0x567   :  { %1328 = vmatpush1.bf16.msra.mxu0 %v2695_v35  ;;  %1369 = vmatpush1.bf16.msra.mxu1 %v2698_v36 }
 0x568   :  { %1329 = vmatprep.subr.bf16.mxu0 %v2701_v37  ;;  %1370 = vmatprep.subr.bf16.mxu1 %v2704_v40 }
 0x56b   :  { %1330 = vmatpush1.bf16.msra.mxu0 %v2707_v41  ;;  %1371 = vmatpush1.bf16.msra.mxu1 %v2710_v44 }
 0x56c   :  { %1331 = vmatprep.subr.bf16.mxu0 %v2713_v45  ;;  %1372 = vmatprep.subr.bf16.mxu1 %v2716_v46 }
 0x56f   :  { %1332 = vmatpush1.bf16.msra.mxu0 %v2719_v47  ;;  %1373 = vmatpush1.bf16.msra.mxu1 %v2722_v48 }
 0x570   :  { %1449 = vmatprep.subr.bf16.mxu0 %v2638_v28  ;;  %1490 = vmatprep.subr.bf16.mxu1 %v2641_v29 }
 0x612   :  { %v1219_v51 = vpop.f32.mrf.mxu0  ;;  %v1260_v25 = vpop.f32.mrf.mxu1 }
 0x613   :  { %v1267_v27 = vadd.f32 %v1219_v51, %v2845_v58  ;;  %v1269_v29 = vadd.f32 %v1260_v25, %v2848_v59 }
 0x614   :  { %v1221_v8 = vpop.f32.mrf.mxu0  ;;  %v1262_v38 = vpop.f32.mrf.mxu1 }
 0x615   :  { %v1690_v9 = vmul.f32 -1.442695, %v1267_v27  ;;  %v1268_v26 = vadd.f32 %v1221_v8, %v2846_v19  ;;  %v1270_v28 = vadd.f32 %v1262_v38, %v2847_v63  ;;  %v1301_v27 = vpop.permute.xlu1 %1300 }
 0x616   :  { %v1223_v5 = vpop.f32.mrf.mxu0  ;;  %v1264_v1 = vpop.f32.mrf.mxu1 }
 0x617   :  { %1849 = vpow2.f32 %v1690_v9  ;;  %v1691_v43 = vmul.f32 -1.442695, %v1268_v26  ;;  %v1692_v61 = vmul.f32 -1.442695, %v1270_v28 }
 0x618   :  { %v1224_v62 = vpop.f32.mrf.mxu0  ;;  %v1265_v54 = vpop.f32.mrf.mxu1 }
 0x619   :  { %1851 = vpow2.f32 %v1691_v43 }
 0x61a   :  { %1853 = vtanh.f32 %v1269_v29 }
 0x61b   :  { %1855 = vpow2.f32 %v1692_v61 }
 0x624   :  { %v1850_v4 = vpop.eup %1849 }
 0x625   :  { %v1274_v2 = vadd.f32 1.0, %v1850_v4 }
 0x626   :  { %v1852_v7 = vpop.eup %1851 }
 0x627   :  { %1857 = vrcp.f32 %v1274_v2  ;;  %v1280_v42 = vadd.f32 1.0, %v1852_v7  ;;  %v1854_v56 = vpop.eup %1853 }
 0x628   :  { %v1856_v49 = vpop.eup %1855 }
 0x629   :  { %1859 = vrcp.f32 %v1280_v42  ;;  %v1287_v39 = vadd.f32 1.0, %v1856_v49 }
 0x62b   :  { %1861 = vrcp.f32 %v1287_v39 }
 0x634   :  { %v1858_v31 = vpop.eup %1857 }
 0x635   :  { %v1291_v57 = vmul.f32 %v1858_v31, %v1854_v56 }
 0x636   :  { %v1860_v50 = vpop.eup %1859 }
 0x637   :  { %v1290_v51 = vmul.f32 %v1860_v50, %v2651_v16 }
 0x638   :  { %v1862_v9 = vpop.eup %1861 }
 0x639   :  { %v1292_v58 = vadd.f32 %v1291_v57, %v1290_v51  ;;  %v2853_v57 = vld [vmem:[#allocation37_spill] sm:$0xff] }
 0x63b   :  { %1863 = vtanh.f32 %v1292_v58  ;;  %v1305_v25 = vsub.f32 %v1292_v58, %v2651_v16 }
 0x63d   :  { %v1306_v8 = vmul.f32 %v1305_v25, %v1301_v27 }
 0x63f   :  { %v2734_v38 = vadd.f32 %v1306_v8, %v2651_v16  ;;  %v2851_v16 = vld [vmem:[#allocation36_spill] sm:$0xff] }
 0x648   :  { %v1864_v19 = vpop.eup %1863 }
 0x649   :  { %v1294_v26 = vmul.f32 %v1864_v19, %v1862_v9 }
 0x64b   :  { %v1297_v5 = vsub.f32 %v1294_v26, %v2655_v55  ;;  %v1308_v1 = vmul.f32 %v1301_v27, %v1294_v26 }
 0x64d   :  { %v1303_v43 = vmul.f32 %v1301_v27, %v1297_v5  ;;  %1310 = vst [vmem:[#allocation11 + $0x28] sm:$0xff] %v1308_v1  ;;  %v2854_v5 = vld [vmem:[#allocation38_spill] sm:$0xff] }
 0x64f   :  { %v2738_v62 = vadd.f32 %v1303_v43, %v2655_v55 }
 0x651   :  { %v1316_v54 = vpack.c.bf16 %v2738_v62, %v2738_v62 }
 0x653   :  { %1350 = vmatmul.mubr.bf16.vlgmr.msra.gmra.mxu0 %v1316_v54  ;;  %1391 = vmatmul.mubr.bf16.vlgmr.msra.gmra.mxu1 %v1316_v54 }
 0x654   :  { %1450 = vmatpush1.bf16.msra.mxu0 %v2580_v11  ;;  %1491 = vmatpush1.bf16.msra.mxu1 %v2583_v17  ;;  %v2849_v17 = vld [vmem:[#allocation33_spill] sm:$0xff] }
 0x655   :  { %1451 = vmatprep.subr.bf16.mxu0 %v2586_v12  ;;  %1492 = vmatprep.subr.bf16.mxu1 %v2589_v13 }
 0x656   :  { %1481 = vmatprep.mubr.bf16.mxu0 %v2834_v6  ;;  %1522 = vmatprep.mubr.bf16.mxu1 %v2834_v6 }
 0x658   :  { %1452 = vmatpush1.bf16.msra.mxu0 %v2594_v0  ;;  %1493 = vmatpush1.bf16.msra.mxu1 %v2597_v14 }
 0x659   :  { %1453 = vmatprep.subr.bf16.mxu0 %v2600_v15  ;;  %1494 = vmatprep.subr.bf16.mxu1 %v2603_v18  ;;  %v2850_v15 = vld [vmem:[#allocation35_spill] sm:$0xff] }
 0x65c   :  { %1454 = vmatpush1.bf16.msra.mxu0 %v2606_v20  ;;  %1495 = vmatpush1.bf16.msra.mxu1 %v2609_v21 }
 0x65d   :  { %1455 = vmatprep.subr.bf16.mxu0 %v2612_v22  ;;  %1496 = vmatprep.subr.bf16.mxu1 %v2615_v23 }
 0x660   :  { %1456 = vmatpush1.bf16.msra.mxu0 %v2618_v24  ;;  %1497 = vmatpush1.bf16.msra.mxu1 %v2674_v60  ;;  %v2852_v60 = vld [vmem:[#allocation34_spill] sm:$0xff] }
 0x661   :  { %1457 = vmatprep.subr.bf16.mxu0 %v2677_v3  ;;  %1498 = vmatprep.subr.bf16.mxu1 %v2680_v10 }
 0x664   :  { %1458 = vmatpush1.bf16.msra.mxu0 %v2683_v30  ;;  %1499 = vmatpush1.bf16.msra.mxu1 %v2686_v32 }
 0x665   :  { %1459 = vmatprep.subr.bf16.mxu0 %v2689_v33  ;;  %1500 = vmatprep.subr.bf16.mxu1 %v2692_v34 }
 0x668   :  { %1460 = vmatpush1.bf16.msra.mxu0 %v2695_v35  ;;  %1501 = vmatpush1.bf16.msra.mxu1 %v2698_v36 }
 0x669   :  { %1461 = vmatprep.subr.bf16.mxu0 %v2701_v37  ;;  %1502 = vmatprep.subr.bf16.mxu1 %v2704_v40 }
 0x66c   :  { %1462 = vmatpush1.bf16.msra.mxu0 %v2707_v41  ;;  %1503 = vmatpush1.bf16.msra.mxu1 %v2710_v44 }
 0x66d   :  { %1463 = vmatprep.subr.bf16.mxu0 %v2713_v45  ;;  %1504 = vmatprep.subr.bf16.mxu1 %v2716_v46 }
 0x670   :  { %1464 = vmatpush1.bf16.msra.mxu0 %v2719_v47  ;;  %1505 = vmatpush1.bf16.msra.mxu1 %v2722_v48  ;;  %v1433_v48 = vpop.permute.xlu0 %1432 }
 0x713   :  { %v1351_v6 = vpop.f32.mrf.mxu0  ;;  %v1392_v11 = vpop.f32.mrf.mxu1 }
 0x714   :  { %v1399_v12 = vadd.f32 %v1351_v6, %v2849_v17  ;;  %v1401_v3 = vadd.f32 %v1392_v11, %v2852_v60 }
 0x715   :  { %v1353_v13 = vpop.f32.mrf.mxu0  ;;  %v1394_v0 = vpop.f32.mrf.mxu1 }
 0x716   :  { %v1694_v14 = vmul.f32 -1.442695, %v1399_v12  ;;  %v1400_v18 = vadd.f32 %v1353_v13, %v2850_v15  ;;  %v1402_v55 = vadd.f32 %v1394_v0, %v2851_v16 }
 0x717   :  { %v1355_v20 = vpop.f32.mrf.mxu0  ;;  %v1396_v21 = vpop.f32.mrf.mxu1 }
 0x718   :  { %1865 = vpow2.f32 %v1694_v14  ;;  %v1695_v22 = vmul.f32 -1.442695, %v1400_v18  ;;  %v1696_v10 = vmul.f32 -1.442695, %v1402_v55  ;;  %v1565_v20 = vpop.permute.xlu1 %1564 }
 0x719   :  { %v1356_v23 = vpop.f32.mrf.mxu0  ;;  %v1397_v24 = vpop.f32.mrf.mxu1 }
 0x71a   :  { %1867 = vpow2.f32 %v1695_v22 }
 0x71b   :  { %1869 = vtanh.f32 %v1401_v3 }
 0x71c   :  { %1871 = vpow2.f32 %v1696_v10 }
 0x725   :  { %v1866_v30 = vpop.eup %1865 }
 0x726   :  { %v1406_v32 = vadd.f32 1.0, %v1866_v30 }
 0x727   :  { %v1868_v33 = vpop.eup %1867 }
 0x728   :  { %1873 = vrcp.f32 %v1406_v32  ;;  %v1412_v34 = vadd.f32 1.0, %v1868_v33  ;;  %v1870_v35 = vpop.eup %1869 }
 0x729   :  { %v1872_v36 = vpop.eup %1871 }
 0x72a   :  { %1875 = vrcp.f32 %v1412_v34  ;;  %v1419_v44 = vadd.f32 1.0, %v1872_v36 }
 0x72c   :  { %1877 = vrcp.f32 %v1419_v44 }
 0x735   :  { %v1874_v37 = vpop.eup %1873 }
 0x736   :  { %v1423_v40 = vmul.f32 %v1874_v37, %v1870_v35 }
 0x737   :  { %v1876_v41 = vpop.eup %1875 }
 0x738   :  { %v1422_v45 = vmul.f32 %v1876_v41, %v2734_v38 }
 0x739   :  { %v1878_v59 = vpop.eup %1877 }
 0x73a   :  { %v1424_v46 = vadd.f32 %v1423_v40, %v1422_v45 }
 0x73c   :  { %1879 = vtanh.f32 %v1424_v46  ;;  %v1437_v47 = vsub.f32 %v1424_v46, %v2734_v38 }
 0x73e   :  { %v1438_v63 = vmul.f32 %v1437_v47, %v1433_v48 }
 0x740   :  { %v1439_v28 = vadd.f32 %v1438_v63, %v2734_v38 }
 0x749   :  { %v1880_v29 = vpop.eup %1879 }
 0x74a   :  { %v1426_v61 = vmul.f32 %v1880_v29, %v1878_v59 }
 0x74c   :  { %v1429_v4 = vsub.f32 %v1426_v61, %v2738_v62  ;;  %v1440_v2 = vmul.f32 %v1433_v48, %v1426_v61 }
 0x74e   :  { %v1435_v7 = vmul.f32 %v1433_v48, %v1429_v4  ;;  %1442 = vst [vmem:[#allocation11 + $0x30] sm:$0xff] %v1440_v2 }
 0x750   :  { %v2783_v42 = vadd.f32 %v1435_v7, %v2738_v62 }
 0x752   :  { %v1448_v56 = vpack.c.bf16 %v2783_v42, %v2783_v42 }
 0x754   :  { %1482 = vmatmul.mubr.bf16.vlgmr.msra.gmra.mxu0 %v1448_v56  ;;  %1523 = vmatmul.mubr.bf16.vlgmr.msra.gmra.mxu1 %v1448_v56 }
 0x814   :  { %v1483_v49 = vpop.f32.mrf.mxu0  ;;  %v1524_v31 = vpop.f32.mrf.mxu1 }
 0x815   :  { %v1531_v50 = vadd.f32 %v1483_v49, %v2853_v57  ;;  %v1533_v1 = vadd.f32 %v1524_v31, %v2854_v5 }
 0x816   :  { %v1485_v39 = vpop.f32.mrf.mxu0  ;;  %v1526_v51 = vpop.f32.mrf.mxu1 }
 0x817   :  { %v1698_v58 = vmul.f32 -1.442695, %v1531_v50  ;;  %v1532_v25 = vadd.f32 %v1485_v39, %v2403_v52  ;;  %v1534_v26 = vadd.f32 %v1526_v51, %v2406_v53 }
 0x818   :  { %v1487_v27 = vpop.f32.mrf.mxu0  ;;  %v1528_v8 = vpop.f32.mrf.mxu1 }
 0x819   :  { %1881 = vpow2.f32 %v1698_v58  ;;  %v1699_v38 = vmul.f32 -1.442695, %v1532_v25  ;;  %v1700_v43 = vmul.f32 -1.442695, %v1534_v26 }
 0x81a   :  { %v1488_v9 = vpop.f32.mrf.mxu0  ;;  %v1529_v19 = vpop.f32.mrf.mxu1 }
 0x81b   :  { %1883 = vpow2.f32 %v1699_v38 }
 0x81c   :  { %1885 = vtanh.f32 %v1533_v1 }
 0x81d   :  { %1887 = vpow2.f32 %v1700_v43 }
 0x826   :  { %v1882_v62 = vpop.eup %1881 }
 0x827   :  { %v1538_v54 = vadd.f32 1.0, %v1882_v62 }
 0x828   :  { %v1884_v6 = vpop.eup %1883 }
 0x829   :  { %1889 = vrcp.f32 %v1538_v54  ;;  %v1544_v11 = vadd.f32 1.0, %v1884_v6  ;;  %v1886_v52 = vpop.eup %1885 }
 0x82a   :  { %v1888_v17 = vpop.eup %1887 }
 0x82b   :  { %1891 = vrcp.f32 %v1544_v11  ;;  %v1551_v14 = vadd.f32 1.0, %v1888_v17 }
 0x82d   :  { %1893 = vrcp.f32 %v1551_v14 }
 0x836   :  { %v1890_v12 = vpop.eup %1889 }
 0x837   :  { %v1555_v13 = vmul.f32 %v1890_v12, %v1886_v52 }
 0x838   :  { %v1892_v0 = vpop.eup %1891 }
 0x839   :  { %v1554_v15 = vmul.f32 %v1892_v0, %v1439_v28 }
 0x83a   :  { %v1894_v23 = vpop.eup %1893 }
 0x83b   :  { %v1556_v18 = vadd.f32 %v1555_v13, %v1554_v15 }
 0x83d   :  { %1895 = vtanh.f32 %v1556_v18  ;;  %v1569_v53 = vsub.f32 %v1556_v18, %v1439_v28 }
 0x83f   :  { %v1570_v21 = vmul.f32 %v1569_v53, %v1565_v20 }
 0x841   :  { %v1571_v22 = vadd.f32 %v1570_v21, %v1439_v28 }
 0x843   :  { %1581 = vst [vmem:[#allocation14] sm:$0xff] %v1571_v22 }
 0x84a   :  { %v1896_v24 = vpop.eup %1895 }
 0x84b   :  { %v1558_v16 = vmul.f32 %v1896_v24, %v1894_v23 }
 0x84d   :  { %v1561_v55 = vsub.f32 %v1558_v16, %v2783_v42  ;;  %v1572_v60 = vmul.f32 %v1565_v20, %v1558_v16 }
 0x84f   :  { %v1567_v3 = vmul.f32 %v1565_v20, %v1561_v55  ;;  %1574 = vst [vmem:[#allocation11 + $0x38] sm:$0xff] %v1572_v60 }
 0x850   :  { %2000 = shalt.err (!%p1997_p5)
}
 0x851   :  { %s2066_s17 = smov 128   ;;  %s2067_s18 = smov 8   ;;  %v1568_v10 = vadd.f32 %v1567_v3, %v2783_v42 }
 0x852   :  { %1593 = dma.vmem_to_hbm [thread:$0]  %s1588_s11, 1024, %s2809_s7, [#allocation7], %s2066_s17, %s2066_s17, %s2067_s18  }
 0x853   :  { %1580 = vst [vmem:[#allocation12] sm:$0xff] %v1568_v10  ;;  %s2009_s20 = scalar_lea.vmem %s1601_s13, 128  ;;  %p2014_p7 = scmp.lt.s32.totalorder %s1601_s13, %s1601_s13 }
 0x854   :  { %p2010_p6 = scmp.ne.s32.totalorder %s1601_s13, %s2009_s20  ;;  %p2015_p8 = scmp.lt.s32.totalorder %s2009_s20, %s2009_s20 }
 0x856   :  { %p2016_p9 = por %p2015_p8, %p2014_p7 }
 0x858   :  { %p2017_p10 = pnand %p2016_p9, %p2010_p6 }
 0x85a   :  { %2020 = shalt.err (!%p2017_p10)
}
 0x85b   :  { %1603 = dma.vmem_to_hbm [thread:$0]  %s1601_s13, 128, %s2810_s8, [#allocation13]  }
 0x85c   :  { %s2029_s2 = scalar_lea.vmem %s1611_s15, 128  ;;  %p2034_p12 = scmp.lt.s32.totalorder %s1611_s15, %s1611_s15 }
 0x85d   :  { %p2030_p11 = scmp.ne.s32.totalorder %s1611_s15, %s2029_s2  ;;  %p2035_p13 = scmp.lt.s32.totalorder %s2029_s2, %s2029_s2 }
 0x85f   :  { %p2036_p0 = por %p2035_p13, %p2034_p12 }
 0x861   :  { %p2037_p1 = pnand %p2036_p0, %p2030_p11 }
 0x863   :  { %2040 = shalt.err (!%p2037_p1)
}
 0x864   :  { %1613 = dma.vmem_to_hbm [thread:$0]  %s1611_s15, 128, %s2811_s9, [#allocation13]  }
 0x865   :  { %2053 = dma.done.wait [#allocation7], 1024  }
 0x866   :  { %2054 = vsyncadd [#allocation7], 4294966272 }
 0x867   :  { %2055 = dma.done.wait [#allocation13], 256  }
 0x868   :  { %2056 = vsyncadd [#allocation13], 4294967040 }
 0x869   :  { %1623 = vsyncpa [#allocation6], 1 }
 0x86a   :  { %1624 = vsyncpa [#allocation9], 1 }
 0x86b   :  { %1625 = vsyncpa [#allocation7], 1 }
 0x86c   :  { %1626 = vsyncpa [#allocation13], 1 }

</bundles_post_ra>
